<compile_context>
chip_gen: v6e
topology: v6e:2x2x1
jax: 0.10.0
libtpu: 0.0.40
codegen_flags: <defaults>
</compile_context>

<pallas_src>
import functools
import math

import jax
import jax.numpy as jnp
from jax.experimental import pallas as pl
from jax.experimental.pallas import tpu as pltpu

_VMEM_LIMIT = 48 * 1024 * 1024  # below v7x's 64 MiB physical VMEM, ample on v5e/v6e


def _cp(*sems):
    return pltpu.CompilerParams(
        dimension_semantics=sems if sems else None,
        vmem_limit_bytes=_VMEM_LIMIT,
    )


def _pick_tile(m, cap):
    """Largest multiple-of-8 divisor of m that is <= cap (else the full m)."""
    if m <= cap:
        return m
    start = cap - (cap % 8)
    for t in range(start, 7, -8):
        if m % t == 0:
            return t
    return m


def _ln_math(z, g, b, eps=1e-5):
    mu = jnp.mean(z, axis=-1, keepdims=True)
    var = jnp.mean((z - mu) ** 2, axis=-1, keepdims=True)
    return (z - mu) * jax.lax.rsqrt(var + eps) * g + b


# --------------------------------------------------------------------------
# Generic linear (M-tiled grid for pipelining)
# --------------------------------------------------------------------------
def _linear_kernel(x_ref, w_ref, b_ref, o_ref, *, act):
    acc = jnp.dot(x_ref[...], w_ref[...], preferred_element_type=jnp.float32) + b_ref[...]
    if act == "relu":
        acc = jnp.maximum(acc, 0.0)
    o_ref[...] = acc.astype(o_ref.dtype)


def pallas_linear(x, w, b=None, act=None, block_m=512):
    """y = x @ w + b  (w stored as [in, out], i.e. torch weight transposed)."""
    m, k = x.shape
    n = w.shape[1]
    if b is None:
        b = jnp.zeros((n,), jnp.float32)
    tm = _pick_tile(m, block_m)
    return pl.pallas_call(
        functools.partial(_linear_kernel, act=act),
        out_shape=jax.ShapeDtypeStruct((m, n), jnp.float32),
        grid=(m // tm,),
        in_specs=[
            pl.BlockSpec((tm, k), lambda i: (i, 0)),
            pl.BlockSpec((k, n), lambda i: (0, 0)),
            pl.BlockSpec((1, n), lambda i: (0, 0)),
        ],
        out_specs=pl.BlockSpec((tm, n), lambda i: (i, 0)),
        compiler_params=_cp("parallel"),
    )(x.astype(jnp.float32), w.astype(jnp.float32), b.reshape(1, n).astype(jnp.float32))


# --------------------------------------------------------------------------
# GATv2Conv: fused lin_l/lin_r projection + attention, grid over heads
# --------------------------------------------------------------------------
def _gatv2_kernel(x_ref, wl_ref, bl_ref, wr_ref, br_ref, att_ref, bias_ref, adj_ref,
                  o_ref, *, neg_slope, jblk):
    x = x_ref[...]                                                     # [N, F]
    xl = jnp.dot(x, wl_ref[0], preferred_element_type=jnp.float32) + bl_ref[0]   # [N, C] source
    xr = jnp.dot(x, wr_ref[0], preferred_element_type=jnp.float32) + br_ref[0]   # [N, C] target
    a = att_ref[0]                                                     # [1, C]
    adj = adj_ref[...]                                                 # [N, N] adj[i,j]=1 iff edge j->i
    n, _ = xl.shape

    # e_ij = a . LeakyReLU(xr_i + xl_j); computed in j-chunks to bound the 3-D intermediate.
    chunks = []
    for j0 in range(0, n, jblk):
        jb = min(jblk, n - j0)
        s = xr[:, None, :] + xl[None, j0:j0 + jb, :]                   # [N, jb, C]
        s = jnp.where(s >= 0, s, neg_slope * s)
        chunks.append(jnp.sum(s * a[None, :, :], axis=-1))             # [N, jb]
    e = chunks[0] if len(chunks) == 1 else jnp.concatenate(chunks, axis=1)

    e = jnp.where(adj > 0, e, -1e30)
    e = e - jnp.max(e, axis=-1, keepdims=True)
    p = jnp.where(adj > 0, jnp.exp(e), 0.0)
    alpha = p * pl.reciprocal(jnp.sum(p, axis=-1, keepdims=True), approx=True)
    out = jnp.dot(alpha, xl, preferred_element_type=jnp.float32) + bias_ref[0]
    o_ref[0] = jnp.maximum(out, 0.0)                                   # ReLU after conv1 fused


def pallas_gatv2(gp, x, adj, neg_slope=0.2):
    h, f, c = gp["wl"].shape
    n = x.shape[0]
    out = pl.pallas_call(
        functools.partial(_gatv2_kernel, neg_slope=neg_slope, jblk=min(128, n)),
        out_shape=jax.ShapeDtypeStruct((h, n, c), jnp.float32),
        grid=(h,),
        in_specs=[
            pl.BlockSpec((n, f), lambda i: (0, 0)),
            pl.BlockSpec((1, f, c), lambda i: (i, 0, 0)),
            pl.BlockSpec((1, 1, c), lambda i: (i, 0, 0)),
            pl.BlockSpec((1, f, c), lambda i: (i, 0, 0)),
            pl.BlockSpec((1, 1, c), lambda i: (i, 0, 0)),
            pl.BlockSpec((1, 1, c), lambda i: (i, 0, 0)),
            pl.BlockSpec((1, 1, c), lambda i: (i, 0, 0)),
            pl.BlockSpec((n, n), lambda i: (0, 0)),
        ],
        out_specs=pl.BlockSpec((1, n, c), lambda i: (i, 0, 0)),
        compiler_params=_cp("parallel"),
    )(x.astype(jnp.float32), gp["wl"], gp["bl"], gp["wr"], gp["br"],
      gp["att"], gp["bias"], adj)
    return out.transpose(1, 0, 2).reshape(n, h * c)                    # concat heads -> [N, H*C]


# --------------------------------------------------------------------------
# GCNConv
# --------------------------------------------------------------------------
def _gcn_kernel(a_ref, x_ref, w_ref, b_ref, o_ref):
    xw = jnp.dot(x_ref[...], w_ref[...], preferred_element_type=jnp.float32)
    out = jnp.dot(a_ref[...], xw, preferred_element_type=jnp.float32) + b_ref[...]
    o_ref[...] = jnp.maximum(out, 0.0)                                 # ReLU after conv2 fused


def pallas_gcn(a_norm, x, w, b):
    n = x.shape[0]
    f = w.shape[1]
    return pl.pallas_call(
        _gcn_kernel,
        out_shape=jax.ShapeDtypeStruct((n, f), jnp.float32),
        compiler_params=_cp(),
    )(a_norm, x, w, b.reshape(1, f))


# --------------------------------------------------------------------------
# Global max/mean pooling over the graph batch
# --------------------------------------------------------------------------
def _pool_kernel(x_ref, m_ref, cnt_ref, max_ref, mean_ref):
    x = x_ref[...]                        # [N, F]
    m = m_ref[...]                        # [B, N]
    cnt = cnt_ref[...]                    # [B, 1]
    n, f = x.shape
    b = m.shape[0]
    x3 = jnp.broadcast_to(x[None, :, :], (b, n, f))
    m3 = jnp.broadcast_to(m[:, :, None], (b, n, f))
    masked = jnp.where(m3 > 0, x3, -1e30)
    mx = jnp.max(masked, axis=1)
    mx = jnp.where(cnt > 0, mx, 0.0)
    sm = jnp.dot(m, x, preferred_element_type=jnp.float32)
    mean = sm / jnp.maximum(cnt, 1.0)
    max_ref[...] = mx
    mean_ref[...] = mean


def pallas_global_pool(x, onehot, counts):
    b = onehot.shape[0]
    f = x.shape[1]
    return pl.pallas_call(
        _pool_kernel,
        out_shape=(jax.ShapeDtypeStruct((b, f), jnp.float32),
                   jax.ShapeDtypeStruct((b, f), jnp.float32)),
        compiler_params=_cp(),
    )(x, onehot, counts)


# --------------------------------------------------------------------------
# pooled_512: temp_batch = 511 for every row -> only group 511 is non-empty.
# Fuse [gmp|gap] pooling + fc into one kernel; rows 0..510 are just the fc bias.
# --------------------------------------------------------------------------
def _pool_fc_kernel(f_ref, wmax_ref, wmean_ref, b_ref, o_ref, *, rows):
    f = f_ref[...]                                                     # [M, K]
    mx = jnp.max(f, axis=0, keepdims=True)                             # [1, K]
    mn = jnp.mean(f, axis=0, keepdims=True)                            # [1, K]
    row = (jnp.dot(mx, wmax_ref[...], preferred_element_type=jnp.float32)
           + jnp.dot(mn, wmean_ref[...], preferred_element_type=jnp.float32)
           + b_ref[...])                                               # [1, OUT]
    rid = jax.lax.broadcasted_iota(jnp.int32, (rows, b_ref.shape[1]), 0)
    o_ref[...] = jnp.where(rid == rows - 1, row, b_ref[...])


def pallas_pool512_fc(feat, w, b, rows=512):
    k = feat.shape[1]
    out_dim = w.shape[1]
    return pl.pallas_call(
        functools.partial(_pool_fc_kernel, rows=rows),
        out_shape=jax.ShapeDtypeStruct((rows, out_dim), jnp.float32),
        compiler_params=_cp(),
    )(feat.astype(jnp.float32), w[:k], w[k:], b.reshape(1, out_dim))


# --------------------------------------------------------------------------
# Decoder blocks (TransformerCPI-style), fused per batch element
# --------------------------------------------------------------------------
def _sa_block_kernel(h_ref, wqkv_ref, bqkv_ref, wo_ref, bo_ref, g_ref, bln_ref, o_ref,
                     *, n_heads, dh, inv_scale):
    h = h_ref[0]                                                       # [S, dm]
    dm = h.shape[-1]
    qkv = jnp.dot(h, wqkv_ref[...], preferred_element_type=jnp.float32) + bqkv_ref[...]
    acc = None
    for hh in range(n_heads):
        lo = hh * dh
        qh = qkv[:, lo:lo + dh] * inv_scale                            # scale q before QK^T
        kh = qkv[:, dm + lo:dm + lo + dh]
        vh = qkv[:, 2 * dm + lo:2 * dm + lo + dh]
        s = jax.lax.dot_general(qh, kh, (((1,), (1,)), ((), ())),
                                preferred_element_type=jnp.float32)    # [S, S]
        s = s - jnp.max(s, axis=-1, keepdims=True)
        p = jnp.exp(s)
        p = p * pl.reciprocal(jnp.sum(p, axis=-1, keepdims=True), approx=True)
        oh = jnp.dot(p, vh, preferred_element_type=jnp.float32)        # [S, dh]
        part = jnp.dot(oh, wo_ref[lo:lo + dh, :], preferred_element_type=jnp.float32)
        acc = part if acc is None else acc + part
    z = h + acc + bo_ref[...]                                          # residual + output bias
    o_ref[0] = _ln_math(z, g_ref[...], bln_ref[...])


def _sa_block(lyr, h, n_heads, dh):
    b, s, dm = h.shape
    sa = lyr["sa"]
    return pl.pallas_call(
        functools.partial(_sa_block_kernel, n_heads=n_heads, dh=dh,
                          inv_scale=1.0 / math.sqrt(dh)),
        out_shape=jax.ShapeDtypeStruct((b, s, dm), jnp.float32),
        grid=(b,),
        in_specs=[
            pl.BlockSpec((1, s, dm), lambda i: (i, 0, 0)),
            pl.BlockSpec((dm, 3 * dm), lambda i: (0, 0)),
            pl.BlockSpec((1, 3 * dm), lambda i: (0, 0)),
            pl.BlockSpec((dm, dm), lambda i: (0, 0)),
            pl.BlockSpec((1, dm), lambda i: (0, 0)),
            pl.BlockSpec((1, dm), lambda i: (0, 0)),
            pl.BlockSpec((1, dm), lambda i: (0, 0)),
        ],
        out_specs=pl.BlockSpec((1, s, dm), lambda i: (i, 0, 0)),
        compiler_params=_cp("parallel"),
    )(h, sa["wqkv"], sa["bqkv"].reshape(1, -1), sa["wo"], sa["bo"].reshape(1, -1),
      lyr["ln1"]["g"].reshape(1, -1), lyr["ln1"]["b"].reshape(1, -1))


def _cross_ffn_kernel(h_ref, src_ref, wv_ref, bv_ref, wo_ref, bo_ref,
                      g2_ref, b2_ref, w1_ref, b1_ref, w2_ref, b2w_ref,
                      g3_ref, b3_ref, o_ref):
    h = h_ref[0]                                                       # [S, dm]
    src = src_ref[0]                                                   # [1, dm]
    # Cross-attention over a length-1 source: softmax over one key is identically 1,
    # so the attention output is just Wo(V(src)) broadcast over the sequence.
    cv = jnp.dot(src, wv_ref[...], preferred_element_type=jnp.float32) + bv_ref[...]
    cv = jnp.dot(cv, wo_ref[...], preferred_element_type=jnp.float32) + bo_ref[...]
    h2 = _ln_math(h + cv, g2_ref[...], b2_ref[...])
    ff = jnp.maximum(jnp.dot(h2, w1_ref[...], preferred_element_type=jnp.float32)
                     + b1_ref[...], 0.0)
    ff = jnp.dot(ff, w2_ref[...], preferred_element_type=jnp.float32) + b2w_ref[...]
    o_ref[0] = _ln_math(h2 + ff, g3_ref[...], b3_ref[...])


def _cross_ffn_block(lyr, h, src):
    b, s, dm = h.shape
    pf = lyr["pf_w1"].shape[1]
    ea = lyr["ea"]
    return pl.pallas_call(
        _cross_ffn_kernel,
        out_shape=jax.ShapeDtypeStruct((b, s, dm), jnp.float32),
        grid=(b,),
        in_specs=[
            pl.BlockSpec((1, s, dm), lambda i: (i, 0, 0)),
            pl.BlockSpec((1, 1, dm), lambda i: (i, 0, 0)),
            pl.BlockSpec((dm, dm), lambda i: (0, 0)),
            pl.BlockSpec((1, dm), lambda i: (0, 0)),
            pl.BlockSpec((dm, dm), lambda i: (0, 0)),
            pl.BlockSpec((1, dm), lambda i: (0, 0)),
            pl.BlockSpec((1, dm), lambda i: (0, 0)),
            pl.BlockSpec((1, dm), lambda i: (0, 0)),
            pl.BlockSpec((dm, pf), lambda i: (0, 0)),
            pl.BlockSpec((1, pf), lambda i: (0, 0)),
            pl.BlockSpec((pf, dm), lambda i: (0, 0)),
            pl.BlockSpec((1, dm), lambda i: (0, 0)),
            pl.BlockSpec((1, dm), lambda i: (0, 0)),
            pl.BlockSpec((1, dm), lambda i: (0, 0)),
        ],
        out_specs=pl.BlockSpec((1, s, dm), lambda i: (i, 0, 0)),
        compiler_params=_cp("parallel"),
    )(h, src, ea["wv"], ea["bv"].reshape(1, -1), ea["wo"], ea["bo"].reshape(1, -1),
      lyr["ln2"]["g"].reshape(1, -1), lyr["ln2"]["b"].reshape(1, -1),
      lyr["pf_w1"], lyr["pf_b1"].reshape(1, -1), lyr["pf_w2"], lyr["pf_b2"].reshape(1, -1),
      lyr["ln3"]["g"].reshape(1, -1), lyr["ln3"]["b"].reshape(1, -1))


def decoder_forward(p, trg, src2d, n_heads=2):
    # TODO(synk): Decoder/DecoderLayer/SelfAttention/PositionwiseFeedforward sources were not
    # provided; a TransformerCPI-style post-LN decoder (ft -> [self-attn, cross-attn, FFN] x 3,
    # dropout=0.0, distinct LayerNorm per sub-layer) returning (trg, attention) is implemented.
    b, s, dm = trg.shape
    dh = dm // n_heads
    h = pallas_linear(trg.reshape(b * s, dm), p["ft_w"], p["ft_b"]).reshape(b, s, dm)
    src = src2d.reshape(b, 1, dm)
    for lyr in p["layers"]:
        h = _sa_block(lyr, h, n_heads, dh)
        h = _cross_ffn_block(lyr, h, src)
    return h, None


# --------------------------------------------------------------------------
# Conv1d(1000 -> 32, k=8) over the embedding axis, as 8 shifted MXU matmuls
# --------------------------------------------------------------------------
def _conv1d_kernel(x_ref, w_ref, b_ref, o_ref, *, kk, wout):
    x = x_ref[0]                                                       # [C=1000, W=128]
    oc = w_ref.shape[1]
    acc = jnp.zeros((oc, wout), jnp.float32)
    for k in range(kk):
        full = jnp.dot(w_ref[k], x, preferred_element_type=jnp.float32)  # [O, W]
        acc = acc + full[:, k:k + wout]
    o_ref[0] = acc + b_ref[...]


def conv1d_xt(p, xseq):
    # PyTorch NCW: xseq [B, C=1000, W=128] -> [B, 32, 121]
    b, c, w = xseq.shape
    kk, oc, _ = p["w"].shape
    wout = w - kk + 1
    return pl.pallas_call(
        functools.partial(_conv1d_kernel, kk=kk, wout=wout),
        out_shape=jax.ShapeDtypeStruct((b, oc, wout), jnp.float32),
        grid=(b,),
        in_specs=[
            pl.BlockSpec((1, c, w), lambda i: (i, 0, 0)),
            pl.BlockSpec((kk, oc, c), lambda i: (0, 0, 0)),
            pl.BlockSpec((oc, 1), lambda i: (0, 0)),
        ],
        out_specs=pl.BlockSpec((1, oc, wout), lambda i: (i, 0, 0)),
        compiler_params=_cp("parallel"),
    )(xseq, p["w"], p["b"].reshape(oc, 1))


# --------------------------------------------------------------------------
# Full forward
# --------------------------------------------------------------------------
def gatv2_gcn_forward(p, data):
    x, adj, batch = data["x"], data["adj"], data["batch"]
    target = data["target"]
    ss_feat, sas_feat, eds_contact = data["ss_feat"], data["sas_feat"], data["eds_contact"]
    num_graphs = data["num_graphs"]

    n = x.shape[0]
    eye = jnp.eye(n, dtype=jnp.float32)
    adj_sl = jnp.clip(adj + eye, 0.0, 1.0)                    # add_self_loops=True (both convs)
    deg = jnp.sum(adj_sl, axis=1)
    dinv = 1.0 / jnp.sqrt(deg)
    a_norm = adj_sl * dinv[:, None] * dinv[None, :]           # GCN D^-1/2 (A+I) D^-1/2

    xnode = pallas_gatv2(p["gat"], x, adj_sl)                 # [N, 780] (ReLU fused)
    xnode = pallas_gcn(a_norm, xnode, p["gcn"]["w"], p["gcn"]["b"])   # [N, 780] (ReLU fused)

    onehot = (batch[None, :] == jnp.arange(num_graphs)[:, None]).astype(jnp.float32)
    counts = jnp.sum(onehot, axis=1, keepdims=True)
    gmax, gmean = pallas_global_pool(xnode, onehot, counts)
    xg = jnp.concatenate([gmax, gmean], axis=1)               # [B, 1560]
    xg = pallas_linear(xg, p["fc_g1"]["w"], p["fc_g1"]["b"], act="relu")
    xg = pallas_linear(xg, p["fc_g2"]["w"], p["fc_g2"]["b"])  # [B, 128]

    ss = pallas_pool512_fc(ss_feat, p["fc_g3"]["w"], p["fc_g3"]["b"])      # [512, 128]
    sas = pallas_pool512_fc(sas_feat, p["fc_g4"]["w"], p["fc_g4"]["b"])    # [512, 128]
    eds = pallas_pool512_fc(eds_contact, p["fc_g5"]["w"], p["fc_g5"]["b"])  # [512, 128]

    emb = jnp.take(p["embed"], target, axis=0)                # [B, 1000, 128] (embedding gather)
    dec_out, _ = decoder_forward(p["decoder"], emb, xg)       # [B, 1000, 128]
    conv = conv1d_xt(p["conv_xt_1"], dec_out)                 # [B, 32, 121]
    xt = conv.reshape(-1, 32 * 121)
    xt = pallas_linear(xt, p["fc1_xt"]["w"], p["fc1_xt"]["b"])  # [B, 128]

    pad_len = ss.shape[0]

    def pad_rows(z):
        # TODO(synk): pad_2d_unsqueeze source not provided; zero-pad rows to 512 (no unsqueeze)
        # so the cat along dim 1 matches fc1's 128*5 input features.
        return jnp.zeros((pad_len, z.shape[1]), z.dtype).at[: z.shape[0]].set(z)

    if xg.shape[0] < pad_len or xt.shape[0] < pad_len:
        xg = pad_rows(xg)
        xt = pad_rows(xt)

    xc = jnp.concatenate([xg, xt, ss, sas, eds], axis=1)      # [512, 640]
    xc = pallas_linear(xc, p["fc1"]["w"], p["fc1"]["b"], act="relu")
    xc = pallas_linear(xc, p["fc2"]["w"], p["fc2"]["b"], act="relu")
    return pallas_linear(xc, p["out"]["w"], p["out"]["b"])    # [512, 1]


# --------------------------------------------------------------------------
# Deterministic parameter init
# --------------------------------------------------------------------------
def init_params(key):
    keys = iter(jax.random.split(key, 512))

    def nrm(shape, s=0.05):
        return jax.random.normal(next(keys), shape, jnp.float32) * s

    def zeros(shape):
        return jnp.zeros(shape, jnp.float32)

    d, h, hid = 78, 10, 128
    p = {}
    # GATv2 weights stored head-major: wl/wr [H, F, C], att/bias [H, 1, C]
    p["gat"] = dict(wl=nrm((h, d, d)), bl=zeros((h, 1, d)),
                    wr=nrm((h, d, d)), br=zeros((h, 1, d)),
                    att=nrm((h, 1, d)), bias=zeros((h, 1, d)))
    p["gcn"] = dict(w=nrm((d * h, d * h)), b=zeros((d * h,)))
    p["fc_g1"] = dict(w=nrm((d * h * 2, 1500)), b=zeros((1500,)))
    p["fc_g2"] = dict(w=nrm((1500, hid)), b=zeros((hid,)))
    p["fc_g3"] = dict(w=nrm((16, hid)), b=zeros((hid,)))
    p["fc_g4"] = dict(w=nrm((6, hid)), b=zeros((hid,)))
    p["fc_g5"] = dict(w=nrm((4, hid)), b=zeros((hid,)))
    p["embed"] = nrm((26, hid), 1.0)

    dec = dict(ft_w=nrm((hid, hid)), ft_b=zeros((hid,)), layers=[])
    for _ in range(3):
        dec["layers"].append(dict(
            ln1=dict(g=jnp.ones((hid,), jnp.float32), b=zeros((hid,))),
            ln2=dict(g=jnp.ones((hid,), jnp.float32), b=zeros((hid,))),
            ln3=dict(g=jnp.ones((hid,), jnp.float32), b=zeros((hid,))),
            sa=dict(wqkv=nrm((hid, 3 * hid)), bqkv=zeros((3 * hid,)),
                    wo=nrm((hid, hid)), bo=zeros((hid,))),
            ea=dict(wv=nrm((hid, hid)), bv=zeros((hid,)),
                    wo=nrm((hid, hid)), bo=zeros((hid,))),
            pf_w1=nrm((hid, 128)), pf_b1=zeros((128,)),
            pf_w2=nrm((128, hid)), pf_b2=zeros((hid,)),
        ))
    p["decoder"] = dec

    p["conv_xt_1"] = dict(w=nrm((8, 32, 1000)), b=zeros((32,)))   # [K, O, C]
    p["fc1_xt"] = dict(w=nrm((32 * 121, hid)), b=zeros((hid,)))
    p["fc1"] = dict(w=nrm((hid * 5, 1024)), b=zeros((1024,)))
    p["fc2"] = dict(w=nrm((1024, 512)), b=zeros((512,)))
    p["out"] = dict(w=nrm((512, 1)), b=zeros((1,)))
    return p


if __name__ == "__main__":
    key = jax.random.PRNGKey(0)
    kx, kadj, kt, kss, ksas, keds = jax.random.split(key, 6)

    n_nodes, n_graphs = 16, 2
    x = jax.random.normal(kx, (n_nodes, 78), jnp.float32)
    batch = jnp.array([0] * 8 + [1] * 8, jnp.int32)
    rnd = jax.random.uniform(kadj, (n_nodes, n_nodes))
    same_graph = (batch[:, None] == batch[None, :]).astype(jnp.float32)
    adj = ((rnd + rnd.T) > 1.0).astype(jnp.float32) * same_graph
    adj = adj * (1.0 - jnp.eye(n_nodes, dtype=jnp.float32))   # self loops added inside the convs

    target = jax.random.randint(kt, (n_graphs, 1000), 0, 26, jnp.int32)
    ss_feat = jax.random.normal(kss, (64, 8), jnp.float32)
    sas_feat = jax.random.normal(ksas, (64, 3), jnp.float32)
    eds_contact = jax.random.normal(keds, (64, 2), jnp.float32)

    params = init_params(jax.random.PRNGKey(1))
    data = dict(x=x, adj=adj, batch=batch, num_graphs=n_graphs, target=target,
                ss_feat=ss_feat, sas_feat=sas_feat, eds_contact=eds_contact)

    out = gatv2_gcn_forward(params, data)
    out = jax.block_until_ready(out)
    assert out.shape == (512, 1)
    print("KERNEL_OK")
</pallas_src>

<mosaic_0001>
module attributes {stable_mosaic.version = 11 : i64} {
  func.func @_gatv2_kernel(%arg0: i32, %arg1: memref<16x78xf32, #tpu.memory_space<vmem>>, %arg2: memref<1x78x78xf32, #tpu.memory_space<vmem>>, %arg3: memref<1x1x78xf32, #tpu.memory_space<vmem>>, %arg4: memref<1x78x78xf32, #tpu.memory_space<vmem>>, %arg5: memref<1x1x78xf32, #tpu.memory_space<vmem>>, %arg6: memref<1x1x78xf32, #tpu.memory_space<vmem>>, %arg7: memref<1x1x78xf32, #tpu.memory_space<vmem>>, %arg8: memref<16x16xf32, #tpu.memory_space<vmem>>, %arg9: memref<1x16x78xf32, #tpu.memory_space<vmem>>) attributes {dimension_semantics = [#tpu.dimension_semantics<parallel>], iteration_bounds = array<i64: 10>, scalar_prefetch = 0 : i64, scratch_operands = 0 : i64, tpu.core_type = #tpu.core_type<tc>, window_params = [{pipeline_mode = #tpu.pipeline_mode<synchronous>, transform_indices = @transform_0, window_bounds = array<i64: 16, 78>}, {transform_indices = @transform_1, window_bounds = array<i64: 1, 78, 78>}, {transform_indices = @transform_2, window_bounds = array<i64: 1, 1, 78>}, {transform_indices = @transform_3, window_bounds = array<i64: 1, 78, 78>}, {transform_indices = @transform_4, window_bounds = array<i64: 1, 1, 78>}, {transform_indices = @transform_5, window_bounds = array<i64: 1, 1, 78>}, {transform_indices = @transform_6, window_bounds = array<i64: 1, 1, 78>}, {pipeline_mode = #tpu.pipeline_mode<synchronous>, transform_indices = @transform_7, window_bounds = array<i64: 16, 16>}, {transform_indices = @transform_8, window_bounds = array<i64: 1, 16, 78>}]} {
    %c0 = arith.constant 0 : index
    %c0_0 = arith.constant 0 : index
    %0 = vector.load %arg1[%c0, %c0_0] : memref<16x78xf32, #tpu.memory_space<vmem>>, vector<16x78xf32>
    %c0_1 = arith.constant 0 : index
    %c0_2 = arith.constant 0 : index
    %c0_3 = arith.constant 0 : index
    %1 = vector.load %arg2[%c0_1, %c0_2, %c0_3] : memref<1x78x78xf32, #tpu.memory_space<vmem>>, vector<1x78x78xf32>
    %2 = vector.shape_cast %1 : vector<1x78x78xf32> to vector<78x78xf32>
    %cst = arith.constant dense<0.000000e+00> : vector<16x78xf32>
    %3 = tpu.matmul %0, %2, %cst {dimension_numbers = #tpu.dot_dimension_numbers<[1], [0], [0], [1], [0, 0, 1, 1], [], []>} : vector<16x78xf32>, vector<78x78xf32>, vector<16x78xf32> -> vector<16x78xf32>
    %c0_4 = arith.constant 0 : index
    %c0_5 = arith.constant 0 : index
    %c0_6 = arith.constant 0 : index
    %4 = vector.load %arg3[%c0_4, %c0_5, %c0_6] : memref<1x1x78xf32, #tpu.memory_space<vmem>>, vector<1x1x78xf32>
    %5 = vector.shape_cast %4 : vector<1x1x78xf32> to vector<1x78xf32>
    %6 = vector.broadcast %5 : vector<1x78xf32> to vector<16x78xf32>
    %7 = arith.addf %3, %6 : vector<16x78xf32>
    %c0_7 = arith.constant 0 : index
    %c0_8 = arith.constant 0 : index
    %c0_9 = arith.constant 0 : index
    %8 = vector.load %arg4[%c0_7, %c0_8, %c0_9] : memref<1x78x78xf32, #tpu.memory_space<vmem>>, vector<1x78x78xf32>
    %9 = vector.shape_cast %8 : vector<1x78x78xf32> to vector<78x78xf32>
    %cst_10 = arith.constant dense<0.000000e+00> : vector<16x78xf32>
    %10 = tpu.matmul %0, %9, %cst_10 {dimension_numbers = #tpu.dot_dimension_numbers<[1], [0], [0], [1], [0, 0, 1, 1], [], []>} : vector<16x78xf32>, vector<78x78xf32>, vector<16x78xf32> -> vector<16x78xf32>
    %c0_11 = arith.constant 0 : index
    %c0_12 = arith.constant 0 : index
    %c0_13 = arith.constant 0 : index
    %11 = vector.load %arg5[%c0_11, %c0_12, %c0_13] : memref<1x1x78xf32, #tpu.memory_space<vmem>>, vector<1x1x78xf32>
    %12 = vector.shape_cast %11 : vector<1x1x78xf32> to vector<1x78xf32>
    %13 = vector.broadcast %12 : vector<1x78xf32> to vector<16x78xf32>
    %14 = arith.addf %10, %13 : vector<16x78xf32>
    %c0_14 = arith.constant 0 : index
    %c0_15 = arith.constant 0 : index
    %c0_16 = arith.constant 0 : index
    %15 = vector.load %arg6[%c0_14, %c0_15, %c0_16] : memref<1x1x78xf32, #tpu.memory_space<vmem>>, vector<1x1x78xf32>
    %16 = vector.shape_cast %15 : vector<1x1x78xf32> to vector<1x78xf32>
    %c0_17 = arith.constant 0 : index
    %c0_18 = arith.constant 0 : index
    %17 = vector.load %arg8[%c0_17, %c0_18] : memref<16x16xf32, #tpu.memory_space<vmem>>, vector<16x16xf32>
    %18 = vector.shape_cast %14 : vector<16x78xf32> to vector<16x1x78xf32>
    %19 = vector.shape_cast %7 : vector<16x78xf32> to vector<1x16x78xf32>
    %20 = vector.broadcast %18 : vector<16x1x78xf32> to vector<16x16x78xf32>
    %21 = vector.broadcast %19 : vector<1x16x78xf32> to vector<16x16x78xf32>
    %22 = arith.addf %20, %21 : vector<16x16x78xf32>
    %cst_19 = arith.constant 0.000000e+00 : f32
    %23 = vector.broadcast %cst_19 : f32 to vector<16x16x78xf32>
    %24 = arith.cmpf oge, %22, %23 : vector<16x16x78xf32>
    %cst_20 = arith.constant 2.000000e-01 : f32
    %25 = vector.broadcast %cst_20 : f32 to vector<16x16x78xf32>
    %26 = arith.mulf %25, %22 : vector<16x16x78xf32>
    %27 = arith.select %24, %22, %26 : vector<16x16x78xi1>, vector<16x16x78xf32>
    %28 = vector.shape_cast %16 : vector<1x78xf32> to vector<1x1x78xf32>
    %29 = vector.broadcast %28 : vector<1x1x78xf32> to vector<16x16x78xf32>
    %30 = arith.mulf %27, %29 : vector<16x16x78xf32>
    %cst_21 = arith.constant dense<0.000000e+00> : vector<16x16xf32>
    %31 = vector.multi_reduction <add>, %30, %cst_21 [2] : vector<16x16x78xf32> to vector<16x16xf32>
    %cst_22 = arith.constant 0.000000e+00 : f32
    %32 = vector.broadcast %cst_22 : f32 to vector<16x16xf32>
    %33 = arith.cmpf ogt, %17, %32 : vector<16x16xf32>
    %cst_23 = arith.constant -1.000000e+30 : f32
    %34 = vector.broadcast %cst_23 : f32 to vector<16x16xf32>
    %35 = arith.select %33, %31, %34 : vector<16x16xi1>, vector<16x16xf32>
    %cst_24 = arith.constant dense<0xFF800000> : vector<16xf32>
    %36 = vector.multi_reduction <maximumf>, %35, %cst_24 [1] : vector<16x16xf32> to vector<16xf32>
    %37 = vector.shape_cast %36 : vector<16xf32> to vector<16x1xf32>
    %38 = vector.broadcast %37 : vector<16x1xf32> to vector<16x16xf32>
    %39 = arith.subf %35, %38 : vector<16x16xf32>
    %cst_25 = arith.constant 0.000000e+00 : f32
    %40 = vector.broadcast %cst_25 : f32 to vector<16x16xf32>
    %41 = arith.cmpf ogt, %17, %40 : vector<16x16xf32>
    %42 = math.exp %39 : vector<16x16xf32>
    %cst_26 = arith.constant 0.000000e+00 : f32
    %43 = vector.broadcast %cst_26 : f32 to vector<16x16xf32>
    %44 = arith.select %41, %42, %43 : vector<16x16xi1>, vector<16x16xf32>
    %cst_27 = arith.constant dense<0.000000e+00> : vector<16xf32>
    %45 = vector.multi_reduction <add>, %44, %cst_27 [1] : vector<16x16xf32> to vector<16xf32>
    %46 = vector.shape_cast %45 : vector<16xf32> to vector<16x1xf32>
    %47 = tpu.reciprocal %46 {approx = true} : vector<16x1xf32> -> vector<16x1xf32>
    %48 = vector.broadcast %47 : vector<16x1xf32> to vector<16x16xf32>
    %49 = arith.mulf %44, %48 : vector<16x16xf32>
    %cst_28 = arith.constant dense<0.000000e+00> : vector<16x78xf32>
    %50 = tpu.matmul %49, %7, %cst_28 {dimension_numbers = #tpu.dot_dimension_numbers<[1], [0], [0], [1], [0, 0, 1, 1], [], []>} : vector<16x16xf32>, vector<16x78xf32>, vector<16x78xf32> -> vector<16x78xf32>
    %c0_29 = arith.constant 0 : index
    %c0_30 = arith.constant 0 : index
    %c0_31 = arith.constant 0 : index
    %51 = vector.load %arg7[%c0_29, %c0_30, %c0_31] : memref<1x1x78xf32, #tpu.memory_space<vmem>>, vector<1x1x78xf32>
    %52 = vector.shape_cast %51 : vector<1x1x78xf32> to vector<1x78xf32>
    %53 = vector.broadcast %52 : vector<1x78xf32> to vector<16x78xf32>
    %54 = arith.addf %50, %53 : vector<16x78xf32>
    %cst_32 = arith.constant 0.000000e+00 : f32
    %55 = vector.broadcast %cst_32 : f32 to vector<16x78xf32>
    %56 = arith.maximumf %54, %55 : vector<16x78xf32>
    %c0_33 = arith.constant 0 : index
    %c0_34 = arith.constant 0 : index
    %c0_35 = arith.constant 0 : index
    %57 = vector.load %arg9[%c0_33, %c0_34, %c0_35] : memref<1x16x78xf32, #tpu.memory_space<vmem>>, vector<1x16x78xf32>
    %58 = vector.shape_cast %57 : vector<1x16x78xf32> to vector<16x78xf32>
    %59 = vector.shape_cast %56 : vector<16x78xf32> to vector<1x16x78xf32>
    tpu.vector_store %arg9[%c0_33, %c0_34, %c0_35], %59 {strides = array<i32>} : memref<1x16x78xf32, #tpu.memory_space<vmem>>, vector<1x16x78xf32>,
    return
  }
  func.func @transform_0(%arg0: i32) -> (i32, i32) {
    %c0_i32 = arith.constant 0 : i32
    %c0_i32_0 = arith.constant 0 : i32
    %c0_i32_1 = arith.constant 0 : i32
    return %c0_i32, %c0_i32_0 : i32, i32
  }
  func.func @transform_1(%arg0: i32) -> (i32, i32, i32) {
    %c0_i32 = arith.constant 0 : i32
    %c0_i32_0 = arith.constant 0 : i32
    %c0_i32_1 = arith.constant 0 : i32
    return %arg0, %c0_i32, %c0_i32_0 : i32, i32, i32
  }
  func.func @transform_2(%arg0: i32) -> (i32, i32, i32) {
    %c0_i32 = arith.constant 0 : i32
    %c0_i32_0 = arith.constant 0 : i32
    %c0_i32_1 = arith.constant 0 : i32
    return %arg0, %c0_i32, %c0_i32_0 : i32, i32, i32
  }
  func.func @transform_3(%arg0: i32) -> (i32, i32, i32) {
    %c0_i32 = arith.constant 0 : i32
    %c0_i32_0 = arith.constant 0 : i32
    %c0_i32_1 = arith.constant 0 : i32
    return %arg0, %c0_i32, %c0_i32_0 : i32, i32, i32
  }
  func.func @transform_4(%arg0: i32) -> (i32, i32, i32) {
    %c0_i32 = arith.constant 0 : i32
    %c0_i32_0 = arith.constant 0 : i32
    %c0_i32_1 = arith.constant 0 : i32
    return %arg0, %c0_i32, %c0_i32_0 : i32, i32, i32
  }
  func.func @transform_5(%arg0: i32) -> (i32, i32, i32) {
    %c0_i32 = arith.constant 0 : i32
    %c0_i32_0 = arith.constant 0 : i32
    %c0_i32_1 = arith.constant 0 : i32
    return %arg0, %c0_i32, %c0_i32_0 : i32, i32, i32
  }
  func.func @transform_6(%arg0: i32) -> (i32, i32, i32) {
    %c0_i32 = arith.constant 0 : i32
    %c0_i32_0 = arith.constant 0 : i32
    %c0_i32_1 = arith.constant 0 : i32
    return %arg0, %c0_i32, %c0_i32_0 : i32, i32, i32
  }
  func.func @transform_7(%arg0: i32) -> (i32, i32) {
    %c0_i32 = arith.constant 0 : i32
    %c0_i32_0 = arith.constant 0 : i32
    %c0_i32_1 = arith.constant 0 : i32
    return %c0_i32, %c0_i32_0 : i32, i32
  }
  func.func @transform_8(%arg0: i32) -> (i32, i32, i32) {
    %c0_i32 = arith.constant 0 : i32
    %c0_i32_0 = arith.constant 0 : i32
    %c0_i32_1 = arith.constant 0 : i32
    return %arg0, %c0_i32, %c0_i32_0 : i32, i32, i32
  }
}

</mosaic_0001>

<bundles_post_ra>
// kernel: tpu_custom_call.1
= control target key start
LH: loop header
LB: loop body
LE: loop exit
PB: predicated region body
PF: predicated region fallthrough
CT: control target
= control target key end

     0   :  { %s2850_s0 = inlined_call_operand.hbm [shape: f32[16,78], index: 0, kind: input, shape index: {}]   ;;  %s2851_s1 = inlined_call_operand.hbm [shape: f32[10,78,78], index: 1, kind: input, shape index: {}]   ;;  %s2852_s2 = inlined_call_operand.hbm [shape: f32[10,1,78], index: 2, kind: input, shape index: {}]   ;;  %s2853_s3 = inlined_call_operand.hbm [shape: f32[10,78,78], index: 3, kind: input, shape index: {}]   ;;  %s2854_s4 = inlined_call_operand.hbm [shape: f32[10,1,78], index: 4, kind: input, shape index: {}]   ;;  %s2855_s5 = inlined_call_operand.hbm [shape: f32[10,1,78], index: 5, kind: input, shape index: {}]   ;;  %s2856_s6 = inlined_call_operand.vmem [shape: f32[10,1,78], index: 6, kind: input, shape index: {}]   ;;  %s2857_s7 = inlined_call_operand.hbm [shape: f32[16,16], index: 7, kind: input, shape index: {}]   ;;  %s2858_s8 = inlined_call_operand.hbm [shape: f32[10,16,78], index: 8, kind: output, shape index: {}]  }
   0x1   :  { %2881 = sst [smem:[#allocation28_spill]] %s2851_s1 }
   0x2   :  { %2882 = sst [smem:[#allocation29_spill]] %s2856_s6 }
   0x3   :  { %2883 = sst [smem:[#allocation30_spill]] %s2857_s7 }
   0x4   :  { %2884 = sst [smem:[#allocation31_spill]] %s2858_s8 }
   0x5   :  { %13 = vsyncpa [#allocation3], 0 }
   0x6   :  { %14 = vsyncpa [#allocation6], 0 }
   0x7   :  { %16 = vsyncpa [#allocation6 + $0x1], 0 }
   0x8   :  { %17 = vsyncpa [#allocation9], 0 }
   0x9   :  { %19 = vsyncpa [#allocation9 + $0x1], 0 }
   0xa   :  { %20 = vsyncpa [#allocation12], 0 }
   0xb   :  { %22 = vsyncpa [#allocation12 + $0x1], 0 }
   0xc   :  { %23 = vsyncpa [#allocation4], 0 }
   0xd   :  { %25 = vsyncpa [#allocation4 + $0x1], 0  ;;  %s2216_s27 = smov 0   ;;  %s2218_s28 = smov 0  }
   0xe   :  { %s2220_s29 = smov 0   ;;  %s2222_s30 = smov 0  }
   0xf LB: > { %2885 = sst [smem:[#allocation21_spill]] %s2144_s27  ;;  %s2237_s9 = sadd.s32 4294967295, %s2156_s30   ;;  %s2156_s30 = sphi %s2222_s30, %s2921_s30   ;;  %s2152_s29 = sphi %s2220_s29, %s2923_s29   ;;  %s2148_s28 = sphi %s2218_s28, %s2925_s28   ;;  %s2144_s27 = sphi %s2216_s27, %s2924_s27  }
  0x10   : > { %2886 = sst [smem:[#allocation22_spill]] %s2152_s29  ;;  %s1666_s10 = sadd.s32 4294967294, %s2156_s30  }
  0x11   : > { %s2241_s11 = sadd.s32 1, %s2156_s30   ;;  %s59_s12 = sadd.s32 1, %s2152_s29 }
  0x12   : > { %2887 = sst [smem:[#allocation23_spill]] %s2241_s11  ;;  %s56_s13 = ssub.s32 %s2156_s30, %s2241_s11 }
  0x13   : > { %p66_p0 = scmp.ne.s32.totalorder %s2152_s29, %s2148_s28  ;;  %p57_p1 = scmp.eq.s32.totalorder %s56_s13, 0 }
  0x14   : > { %p67_p2 = scmp.eq.s32.totalorder %s2156_s30, 0  ;;  %p72_p3 = scmp.ne.s32.totalorder %s2148_s28, %s2144_s27 }
  0x15   : > { %p2859_p4 = scmp.eq.s32.totalorder %s2237_s9, 0  ;;  %p247_p7 = scmp.eq.s32.totalorder %s2237_s9, 9 }
  0x16   : > { %s2253_s14 = scalar_select %p57_p1, %s2152_s29, %s59_s12  }
  0x17   : > { %p2255_p5 = por %p67_p2, %p66_p0  ;;  %p2261_p6 = por %p2859_p4, %p72_p3 }
  0x18   : > { %2888 = sst [smem:[#allocation24_spill]] %s2253_s14  ;;  %p253_p8 = scmp.eq.s32.totalorder %s1666_s10, 9 }
  0x19   : > { %s2890_s16 = scalar_select %p2261_p6, 1, 0 }
  0x1a   : > { %p1667_p9 = scmp.ge.s32.totalorder %s2156_s30, 1  ;;  %p260_p10 = scmp.lt.s32.totalorder %s2156_s30, 11 }
  0x1b   : > { %2891 = sst [smem:[#allocation25_spill]] %s2890_s16  ;;  %p2268_p11 = por %p247_p7, %p66_p0 }
  0x1c   : > { %p2272_p12 = por %p253_p8, %p72_p3  ;;  %p2276_p13 = pnand %p1667_p9, %p260_p10 }
  0x1d   : > { %s2892_s17 = scalar_select %p2268_p11, 1, 0 }
  0x1e   : > { %s2894_s18 = scalar_select %p2272_p12, 1, 0 }
  0x1f   : > { %2893 = sst [smem:[#allocation26_spill]] %s2892_s17  ;;  %p1804_p1 = pneg %p2276_p13 }
  0x20   : > { %2895 = sst [smem:[#allocation27_spill]] %s2894_s18  ;;  %s2158_s20 = smov [#allocation13]  }
  0x21   : > { %s2896_s19 = scalar_select %p2276_p13, 1, 0 }
  0x22   : > { %s285_s21 = sshll.u32 %s2158_s20, 4  ;;  %p2284_p2 = pnand %p1804_p1, %p2859_p4  ;;  %s286_s21 = int_to_ptr.vmem [resolvable:$true] %s285_s21 }
  0x23   : > { %p1833_p0 = scmp.lt.s32.totalorder %s2156_s30, 10  ;;  %s2290_s23 = sand.u32 1, %s2156_s30  }
  0x24   : > { %s2897_s22 = scalar_select %p2284_p2, 1, 0 }
  0x25   : > { %p2870_p3 = pneg %p2284_p2  ;;  %s1895_s24 = scalar_lea.vmem %s286_s21, 256 }
  0x26   : > { %p1896_p7 = scmp.ne.s32.totalorder %s286_s21, %s1895_s24  ;;  %p1903_p10 = scmp.lt.s32.totalorder %s286_s21, %s286_s21 }
  0x27   : > { %p1904_p12 = scmp.lt.s32.totalorder %s1895_s24, %s1895_s24 }
  0x28   : > { %p1898_p8 = pnand %p1896_p7, %p2870_p3 }
  0x29   : > { %p1905_p1 = por %p1904_p12, %p1903_p10 }
  0x2a   : > { %p1899_p9 = pneg %p1898_p8 }
  0x2c   : > { %p1906_p4 = pnand %p1905_p1, %p1899_p9 }
  0x2e   : > { %1909 = shalt.err (!%p1906_p4)
}
  0x2f   : > { %s2864_s25 = smov 128   ;;  %s2866_s26 = smov 8  }
  0x30   : > { %s2898_s7 = sld [smem:[#allocation30_spill]]  ;;  %s2306_s13 = sand.u32 1, %s2152_s29  }
  0x31   : > { %s1780_s20 = smul.u32 1280, %s2156_s30  ;;  %p2314_p4 = pnand %p1833_p0, %p2255_p5 }
  0x32   : > { %s2868_s24 = smul.u32 80, %s2306_s13  ;;  %s2900_s1 = sld [smem:[#allocation28_spill]] }
  0x33   : > { %p2337_p12 = pneg %p2314_p4 }
  0x36   : > { %1810 = dma.hbm_to_vmem [thread:$0]  (!%p2284_p2), %s2898_s7, 256, %s286_s21, [#allocation12], %s2864_s25, %s2864_s25, %s2866_s26  }
  0x37   : > { %s303_s21 = scalar_lea.vmem [#allocation5], %s2868_s24  ;;  %s2330_s25 = scalar_lea.hbm %s2853_s3, %s1780_s20 }
  0x38   : > { %s2321_s27 = scalar_lea.hbm %s2900_s1, %s1780_s20  ;;  %s310_s10 = sshll.u32 %s303_s21, 4  ;;  %s2325_s10 = int_to_ptr.vmem [resolvable:$true] %s310_s10 }
  0x39   : > { %s300_s26 = scalar_lea.sflag [#allocation6], %s2290_s23  ;;  %s1910_s7 = scalar_lea.hbm %s2321_s27, 1280 }
  0x3a   : > { %p1911_p5 = scmp.ne.s32.totalorder %s2321_s27, %s1910_s7  ;;  %s1915_s24 = scalar_lea.hbm %s2900_s1, 12800 }
  0x3b   : > { %p1916_p8 = scmp.lt.s32.totalorder %s2321_s27, %s2900_s1  ;;  %p1917_p9 = scmp.lt.s32.totalorder %s1915_s24, %s1910_s7 }
  0x3c   : > { %p1913_p0 = pnand %p2337_p12, %p1911_p5 }
  0x3d   : > { %p1918_p10 = por %p1917_p9, %p1916_p8 }
  0x3e   : > { %p1914_p7 = pneg %p1913_p0 }
  0x40   : > { %p1919_p1 = pnand %p1918_p10, %p1914_p7 }
  0x42   : > { %1922 = shalt.err (!%p1919_p1)
}
  0x43   : > { %s1923_s20 = scalar_lea.vmem %s2325_s10, 1280  ;;  %s2161_s12 = smov [#allocation5]  }
  0x44   : > { %p1924_p3 = scmp.ne.s32.totalorder %s2325_s10, %s1923_s20  ;;  %s1928_s18 = sshll.u32 %s2161_s12, 4  ;;  %s1929_s18 = int_to_ptr.vmem [resolvable:$false] %s1928_s18 }
  0x45   : > { %s1930_s21 = scalar_lea.vmem %s1929_s18, 2560  ;;  %p1931_p11 = scmp.lt.s32.totalorder %s2325_s10, %s1929_s18 }
  0x46   : > { %p1926_p5 = pnand %p1924_p3, %p2337_p12  ;;  %p1932_p6 = scmp.lt.s32.totalorder %s1930_s21, %s1923_s20 }
  0x48   : > { %p1927_p0 = pneg %p1926_p5  ;;  %p1933_p13 = por %p1932_p6, %p1931_p11 }
  0x4a   : > { %p1934_p2 = pnand %p1933_p13, %p1927_p0 }
  0x4c   : > { %1937 = shalt.err (!%p1934_p2)
}
  0x4d   : > { %s2902_s7 = smov 8   ;;  %s2903_s29 = smov 128  }
  0x4e   : > { %1814 = dma.hbm_to_vmem [thread:$0]  (!%p2314_p4), %s2321_s27, 1280, %s2325_s10, %s300_s26, %s2903_s29, %s2903_s29, %s2902_s7  }
  0x4f   : > { %s2904_s24 = smul.u32 80, %s2306_s13  ;;  %s2162_s12 = smov [#allocation2]  }
  0x50   : > { %s2368_s18 = sshll.u32 %s2162_s12, 4  ;;  %s338_s21 = scalar_lea.sflag [#allocation9], %s2290_s23  ;;  %s273_s18 = int_to_ptr.vmem [resolvable:$true] %s2368_s18 }
  0x51   : > { %s341_s15 = scalar_lea.vmem [#allocation8], %s2904_s24  ;;  %s1938_s1 = scalar_lea.hbm %s2330_s25, 1280 }
  0x52   : > { %s348_s20 = sshll.u32 %s341_s15, 4  ;;  %p1939_p6 = scmp.ne.s32.totalorder %s2330_s25, %s1938_s1  ;;  %s2366_s20 = int_to_ptr.vmem [resolvable:$true] %s348_s20 }
  0x53   : > { %s1943_s6 = scalar_lea.hbm %s2853_s3, 12800  ;;  %p1944_p2 = scmp.lt.s32.totalorder %s2330_s25, %s2853_s3 }
  0x54   : > { %p1941_p11 = pnand %p1939_p6, %p2337_p12  ;;  %p1945_p3 = scmp.lt.s32.totalorder %s1943_s6, %s1938_s1 }
  0x56   : > { %p1942_p13 = pneg %p1941_p11  ;;  %p1946_p7 = por %p1945_p3, %p1944_p2 }
  0x58   : > { %p1947_p8 = pnand %p1946_p7, %p1942_p13 }
  0x5a   : > { %1950 = shalt.err (!%p1947_p8)
}
  0x5b   : > { %s1951_s10 = scalar_lea.vmem %s2366_s20, 1280  ;;  %s2163_s24 = smov [#allocation8]  }
  0x5c   : > { %p1952_p9 = scmp.ne.s32.totalorder %s2366_s20, %s1951_s10  ;;  %s1956_s8 = sshll.u32 %s2163_s24, 4  ;;  %s1957_s8 = int_to_ptr.vmem [resolvable:$false] %s1956_s8 }
  0x5d   : > { %s1958_s17 = scalar_lea.vmem %s1957_s8, 2560  ;;  %p1959_p5 = scmp.lt.s32.totalorder %s2366_s20, %s1957_s8 }
  0x5e   : > { %p1954_p10 = pnand %p1952_p9, %p2337_p12  ;;  %p1960_p0 = scmp.lt.s32.totalorder %s1958_s17, %s1951_s10 }
  0x60   : > { %p1955_p1 = pneg %p1954_p10  ;;  %p1961_p6 = por %p1960_p0, %p1959_p5 }
  0x62   : > { %p1962_p11 = pnand %p1961_p6, %p1955_p1 }
  0x64   : > { %1965 = shalt.err (!%p1962_p11)
}
  0x65   : > { %1820 = dma.hbm_to_vmem [thread:$0]  (!%p2314_p4), %s2330_s25, 1280, %s2366_s20, %s338_s21, %s2903_s29, %s2903_s29, %s2902_s7  }
  0x66   : > { %s1977_s1 = scalar_lea.vmem %s273_s18, 256  ;;  %p2905_p2 = scmp.ne.s32.totalorder %s2897_s22, 0 }
  0x67   : > { %p1978_p13 = scmp.ne.s32.totalorder %s273_s18, %s1977_s1  ;;  %p1985_p9 = scmp.lt.s32.totalorder %s273_s18, %s273_s18 }
  0x68   : > { %p2906_p3 = pneg %p2905_p2  ;;  %p1986_p10 = scmp.lt.s32.totalorder %s1977_s1, %s1977_s1 }
  0x6a   : > { %p1980_p7 = pnand %p1978_p13, %p2906_p3  ;;  %p1987_p1 = por %p1986_p10, %p1985_p9 }
  0x6c   : > { %p1981_p8 = pneg %p1980_p7 }
  0x6e   : > { %p1988_p5 = pnand %p1987_p1, %p1981_p8 }
  0x70   : > { %1991 = shalt.err (!%p1988_p5)
}
  0x71   : > { %1807 = dma.hbm_to_vmem [thread:$0]  (!%p2905_p2), %s2850_s0, 256, %s273_s18, [#allocation3], %s2903_s29, %s2903_s29, %s2902_s7  }
  0x72   : > { %s2409_s25 = sshll.u32 %s2156_s30, 4  ;;  %s323_s15 = scalar_lea.vmem [#allocation7], %s2306_s13 }
  0x73   : > { %s330_s20 = sshll.u32 %s323_s15, 4  ;;  %s328_s10 = scalar_lea.hbm %s2852_s2, %s2409_s25  ;;  %s331_s20 = int_to_ptr.vmem [resolvable:$true] %s330_s20 }
  0x74   : > { %s1992_s22 = scalar_lea.hbm %s328_s10, 16  ;;  %s1997_s17 = scalar_lea.hbm %s2852_s2, 160 }
  0x75   : > { %p1993_p0 = scmp.ne.s32.totalorder %s328_s10, %s1992_s22  ;;  %p1998_p13 = scmp.lt.s32.totalorder %s328_s10, %s2852_s2 }
  0x76   : > { %p1999_p2 = scmp.lt.s32.totalorder %s1997_s17, %s1992_s22 }
  0x77   : > { %p1995_p6 = pnand %p1993_p0, %p2337_p12 }
  0x78   : > { %p2000_p3 = por %p1999_p2, %p1998_p13 }
  0x79   : > { %p1996_p11 = pneg %p1995_p6 }
  0x7b   : > { %p2001_p7 = pnand %p2000_p3, %p1996_p11 }
  0x7d   : > { %2004 = shalt.err (!%p2001_p7)
}
  0x7e   : > { %s2005_s18 = scalar_lea.vmem %s331_s20, 16  ;;  %s2164_s1 = smov [#allocation7]  }
  0x7f   : > { %p2006_p8 = scmp.ne.s32.totalorder %s331_s20, %s2005_s18  ;;  %s2010_s6 = sshll.u32 %s2164_s1, 4  ;;  %s2011_s6 = int_to_ptr.vmem [resolvable:$false] %s2010_s6 }
  0x80   : > { %s2012_s16 = scalar_lea.vmem %s2011_s6, 32  ;;  %p2013_p1 = scmp.lt.s32.totalorder %s331_s20, %s2011_s6 }
  0x81   : > { %p2008_p9 = pnand %p2006_p8, %p2337_p12  ;;  %p2014_p5 = scmp.lt.s32.totalorder %s2012_s16, %s2005_s18 }
  0x83   : > { %p2009_p10 = pneg %p2008_p9  ;;  %p2015_p0 = por %p2014_p5, %p2013_p1 }
  0x85   : > { %p2016_p6 = pnand %p2015_p0, %p2009_p10 }
  0x87   : > { %2019 = shalt.err (!%p2016_p6)
}
  0x88   : > { %1817 = dma.hbm_to_vmem [thread:$0]  (!%p2314_p4), %s328_s10, 16, %s331_s20, %s300_s26  }
  0x89   : > { %s366_s27 = scalar_lea.hbm %s2854_s4, %s2409_s25  ;;  %s361_s22 = scalar_lea.vmem [#allocation10], %s2306_s13 }
  0x8a   : > { %s368_s24 = sshll.u32 %s361_s22, 4  ;;  %s2020_s8 = scalar_lea.hbm %s366_s27, 16  ;;  %s369_s24 = int_to_ptr.vmem [resolvable:$true] %s368_s24 }
  0x8b   : > { %p2021_p11 = scmp.ne.s32.totalorder %s366_s27, %s2020_s8  ;;  %s2025_s29 = scalar_lea.hbm %s2854_s4, 160 }
  0x8c   : > { %p2026_p3 = scmp.lt.s32.totalorder %s366_s27, %s2854_s4  ;;  %p2027_p7 = scmp.lt.s32.totalorder %s2025_s29, %s2020_s8 }
  0x8d   : > { %p2023_p13 = pnand %p2021_p11, %p2337_p12 }
  0x8e   : > { %p2028_p8 = por %p2027_p7, %p2026_p3 }
  0x8f   : > { %p2024_p2 = pneg %p2023_p13 }
  0x91   : > { %p2029_p9 = pnand %p2028_p8, %p2024_p2 }
  0x93   : > { %2032 = shalt.err (!%p2029_p9)
}
  0x94   : > { %s2033_s26 = scalar_lea.vmem %s369_s24, 16  ;;  %s2165_s20 = smov [#allocation10]  }
  0x95   : > { %p2034_p10 = scmp.ne.s32.totalorder %s369_s24, %s2033_s26  ;;  %s2038_s10 = sshll.u32 %s2165_s20, 4  ;;  %s2039_s10 = int_to_ptr.vmem [resolvable:$false] %s2038_s10 }
  0x96   : > { %s2040_s6 = scalar_lea.vmem %s2039_s10, 32  ;;  %p2041_p0 = scmp.lt.s32.totalorder %s369_s24, %s2039_s10 }
  0x97   : > { %p2036_p1 = pnand %p2034_p10, %p2337_p12  ;;  %p2042_p6 = scmp.lt.s32.totalorder %s2040_s6, %s2033_s26 }
  0x99   : > { %p2037_p5 = pneg %p2036_p1  ;;  %p2043_p11 = por %p2042_p6, %p2041_p0 }
  0x9b   : > { %p2044_p13 = pnand %p2043_p11, %p2037_p5 }
  0x9d   : > { %2047 = shalt.err (!%p2044_p13)
}
  0x9e   : > { %1823 = dma.hbm_to_vmem [thread:$0]  (!%p2314_p4), %s366_s27, 16, %s369_s24, %s338_s21  }
  0x9f   : > { %s2453_s12 = scalar_lea.hbm %s2855_s5, %s2409_s25  ;;  %s378_s22 = scalar_lea.vmem [#allocation11], %s2306_s13 }
  0xa0   : > { %s385_s8 = sshll.u32 %s378_s22, 4  ;;  %s376_s17 = scalar_lea.sflag [#allocation12], %s2290_s23  ;;  %s386_s8 = int_to_ptr.vmem [resolvable:$true] %s385_s8 }
  0xa1   : > { %s2048_s7 = scalar_lea.hbm %s2453_s12, 16  ;;  %s2053_s21 = scalar_lea.hbm %s2855_s5, 160 }
  0xa2   : > { %p2049_p2 = scmp.ne.s32.totalorder %s2453_s12, %s2048_s7  ;;  %p2054_p8 = scmp.lt.s32.totalorder %s2453_s12, %s2855_s5 }
  0xa3   : > { %p2055_p9 = scmp.lt.s32.totalorder %s2053_s21, %s2048_s7 }
  0xa4   : > { %p2051_p3 = pnand %p2049_p2, %p2337_p12 }
  0xa5   : > { %p2056_p10 = por %p2055_p9, %p2054_p8 }
  0xa6   : > { %p2052_p7 = pneg %p2051_p3 }
  0xa8   : > { %p2057_p1 = pnand %p2056_p10, %p2052_p7 }
  0xaa   : > { %2060 = shalt.err (!%p2057_p1)
}
  0xab   : > { %s2061_s13 = scalar_lea.vmem %s386_s8, 16  ;;  %s2166_s23 = smov [#allocation11]  }
  0xac   : > { %p2062_p5 = scmp.ne.s32.totalorder %s386_s8, %s2061_s13  ;;  %s2066_s25 = sshll.u32 %s2166_s23, 4  ;;  %s2067_s25 = int_to_ptr.vmem [resolvable:$false] %s2066_s25 }
  0xad   : > { %s2068_s1 = scalar_lea.vmem %s2067_s25, 32  ;;  %p2069_p11 = scmp.lt.s32.totalorder %s386_s8, %s2067_s25 }
  0xae   : > { %p2064_p0 = pnand %p2062_p5, %p2337_p12  ;;  %p2070_p13 = scmp.lt.s32.totalorder %s2068_s1, %s2061_s13 }
  0xb0   : > { %p2065_p6 = pneg %p2064_p0  ;;  %p2071_p2 = por %p2070_p13, %p2069_p11 }
  0xb2   : > { %p2072_p3 = pnand %p2071_p2, %p2065_p6 }
  0xb4   : > { %2075 = shalt.err (!%p2072_p3)
}
  0xb5   : > { %1826 = dma.hbm_to_vmem [thread:$0]  (!%p2314_p4), %s2453_s12, 16, %s386_s8, %s376_s17  }
  0xb6   : > { %p2907_p7 = scmp.ne.s32.totalorder %s2896_s19, 0 }
  0xb7   : > { %p2908_p8 = scmp.eq.s32.totalorder (!%p2907_p7), %s2237_s9, 0 }
  0xb8   : > { %400 = sbr.rel (%p2907_p7) target bundleno = 1169 (0x491), region = 52 }
  0xbd   : > { %2119 = dma.done.wait (%p2908_p8), [#allocation3], 256   ;;  %p2909_p12 = pmov %p2908_p8 }
  0xbe   : > { %s2910_s11 = sld [smem:[#allocation25_spill]]  ;;  %s406_s26 = sand.u32 1, %s2237_s9  }
  0xbf   : > { %2121 = vsyncadd (%p2909_p12), [#allocation3], 4294967040  ;;  %s2481_s20 = sand.u32 1, %s2148_s28   ;;  %s407_s14 = scalar_lea.sflag [#allocation6], %s406_s26 }
  0xc0   : > { %s1783_s10 = smul.u32 80, %s2481_s20 }
  0xc2   : > { %s2484_s6 = scalar_lea.vmem [#allocation5], %s1783_s10 }
  0xc4   : > { %p2911_p4 = scmp.ne.s32.totalorder %s2910_s11, 0 }
  0xc6   : > { %2123 = dma.done.wait (%p2911_p4), %s407_s14, 1296  }
  0xc7   : > { %2125 = vsyncadd (%p2911_p4), %s407_s14, 4294966000  ;;  %s418_s19 = scalar_lea.vmem [#allocation7], %s2481_s20  ;;  %s424_s16 = scalar_lea.sflag [#allocation9], %s406_s26 }
  0xc8   : > { %s2491_s15 = scalar_lea.vmem [#allocation8], %s1783_s10 }
  0xc9   : > { %2127 = dma.done.wait (%p2911_p4), %s424_s16, 1296  }
  0xca   : > { %2129 = vsyncadd (%p2911_p4), %s424_s16, 4294966000  ;;  %s435_s12 = scalar_lea.vmem [#allocation10], %s2481_s20  ;;  %s441_s22 = scalar_lea.sflag [#allocation12], %s406_s26 }
  0xcb   : > { %s443_s8 = scalar_lea.vmem [#allocation11], %s2481_s20 }
  0xcc   : > { %2131 = dma.done.wait (%p2911_p4), %s441_s22, 16  }
  0xcd   : > { %2133 = vsyncadd (%p2911_p4), %s441_s22, 4294967280  ;;  %p2912_p9 = pmov %p2908_p8 }
  0xce   : > { %p2913_p10 = pmov %p2908_p8 }
  0xcf   : > { %2135 = dma.done.wait (%p2912_p9), [#allocation12], 256  }
  0xd0   : > { %2137 = vsyncadd (%p2913_p10), [#allocation12], 4294967040  ;;  %vm529_vm0 = vcmask 1045504   ;;  %v617_v0 = vld [vmem:[%s2491_s15 + $0x48] sm:$0x3f]  ;;  %v616_v2 = vld [vmem:[%s2491_s15 + $0x40] sm:$0xff]  ;;  %v712_v22 = vlaneseq }
  0xd1   : > { %v514_v1 = vld [vmem:[%s2484_s6 + $0x48] sm:$0x3f]  ;;  %1749 = vmatprep.subr.msk.mxu1 %vm529_vm0, %v617_v0  ;;  %v513_v3 = vld [vmem:[%s2484_s6 + $0x40] sm:$0xff]  ;;  %v512_v5 = vld [vmem:[%s2484_s6 + $0x38] sm:$0xff]  ;;  %vm522_vm1 = vcmask 637952   ;;  %p500_p1 = scmp.lt.s32.totalorder %s2237_s9, 9 }
  0xd2   : > { %1726 = vmatprep.subr.msk.mxu0 %vm529_vm0, %v514_v1  ;;  %1750 = vmatpush3.msk.msra.mxu1 %vm529_vm0, %v617_v0  ;;  %v615_v4 = vld [vmem:[%s2491_s15 + $0x38] sm:$0xff]  ;;  %v614_v6 = vld [vmem:[%s2491_s15 + $0x30] sm:$0xff]  ;;  %v613_v8 = vld [vmem:[%s2491_s15 + $0x28] sm:$0xff]  ;;  %v713_v23 = vshrl.u32 %v712_v22, 7  ;;  %v1183_v24 = vand.u32 127, %v712_v22  ;;  %s1679_s7 = sshll.u32 %s2481_s20, 4 }
  0xd3   : > { %1727 = vmatpush3.msk.msra.mxu0 %vm529_vm0, %v514_v1  ;;  %1751 = vmatprep.subr.mxu1 %v616_v2  ;;  %v511_v7 = vld [vmem:[%s2484_s6 + $0x30] sm:$0xff]  ;;  %v510_v9 = vld [vmem:[%s2484_s6 + $0x28] sm:$0xff]  ;;  %v509_v11 = vld [vmem:[%s2484_s6 + $0x20] sm:$0xff]  ;;  %v2167_v28 = vmov 1966171168   ;;  %s501_s17 = scalar_select %p500_p1, %s2237_s9, 9 }
  0xd4   : > { %1728 = vmatprep.subr.mxu0 %v513_v3  ;;  %1752 = vmatpush3.msra.mxu1 %v616_v2  ;;  %v612_v10 = vld [vmem:[%s2491_s15 + $0x20] sm:$0xff]  ;;  %v611_v12 = vld [vmem:[%s2491_s15 + $0x18] sm:$0xff]  ;;  %v610_v14 = vld [vmem:[%s2491_s15 + $0x10] sm:$0xff]  ;;  %v2531_v25 = vsub.s32 %v1183_v24, %v713_v23  ;;  %v1188_v26 = vadd.s32 4294967288, %v1183_v24  ;;  %v710_v29 = vunpack.c.l.s4 %v2167_v28  ;;  %v2547_v44 = vsub.s32 0, %v713_v23  ;;  %s2914_s21 = sld [smem:[#allocation29_spill]] }
  0xd5   : > { %1729 = vmatpush3.msra.mxu0 %v513_v3  ;;  %1753 = vmatprep.subr.mxu1 %v615_v4  ;;  %v508_v13 = vld [vmem:[%s2484_s6 + $0x18] sm:$0xff]  ;;  %v507_v15 = vld [vmem:[%s2484_s6 + $0x10] sm:$0xff]  ;;  %v506_v17 = vld [vmem:[%s2484_s6 + $0x8] sm:$0xff]  ;;  %s2915_s24 = sld [smem:[#allocation26_spill]]  ;;  %s499_s13 = scalar_lea.vmem [#allocation14], %s1679_s7 }
  0xd6   : > { %1730 = vmatprep.subr.mxu0 %v512_v5  ;;  %1754 = vmatpush3.msra.mxu1 %v615_v4  ;;  %v609_v16 = vld [vmem:[%s2491_s15 + $0x8] sm:$0xff]  ;;  %v608_v18 = vld [vmem:[%s2491_s15] sm:$0xff]  ;;  %v2533_v27 = vsub.s32 %v1188_v26, %v713_v23  ;;  %v711_v30 = vunpack.c.0.s8 %v710_v29  ;;  %s1486_s23 = sshll.u32 %s499_s13, 4  ;;  %s1697_s25 = sshll.u32 %s2237_s9, 8  ;;  %s2806_s23 = int_to_ptr.vmem [resolvable:$true] %s1486_s23 }
  0xd7   : > { %1731 = vmatpush3.msra.mxu0 %v512_v5  ;;  %1755 = vmatprep.subr.mxu1 %v614_v6  ;;  %v505_v19 = vld [vmem:[%s2484_s6] sm:$0xff]  ;;  %v504_v21 = vld [vmem:[#allocation2 + $0x8] sm:$0xff]  ;;  %s2916_s26 = sld [smem:[#allocation31_spill]]  ;;  %s1473_s14 = scalar_lea.sflag [#allocation4], %s2481_s20 }
  0xd8   : > { %1732 = vmatprep.subr.mxu0 %v511_v7  ;;  %1756 = vmatpush3.msra.mxu1 %v614_v6  ;;  %v503_v20 = vld [vmem:[#allocation2] sm:$0xff]  ;;  %v2539_v33 = vsub.s32 %v711_v30, %v713_v23  ;;  %s2076_s9 = scalar_lea.vmem %s2806_s23, 256  ;;  %s2168_s6 = smov [#allocation14]  }
  0xd9   : > { %1733 = vmatpush3.msra.mxu0 %v511_v7  ;;  %1757 = vmatprep.subr.mxu1 %v613_v8  ;;  %v1684_v31 = vld [vmem:[%s435_s12] ss:$0 sm:$0xff]  ;;  %p2077_p5 = scmp.ne.s32.totalorder %s2806_s23, %s2076_s9 }
  0xda   : > { %1734 = vmatprep.subr.mxu0 %v510_v9  ;;  %1758 = vmatpush3.msra.mxu1 %v613_v8  ;;  %v1680_v32 = vld [vmem:[%s418_s19] ss:$0 sm:$0xff]  ;;  %s502_s27 = scalar_lea.vmem %s2914_s21, %s501_s17  ;;  %s2080_s19 = sshll.u32 %s2168_s6, 4  ;;  %s2081_s19 = int_to_ptr.vmem [resolvable:$false] %s2080_s19 }
  0xdb   : > { %1735 = vmatpush3.msra.mxu0 %v510_v9  ;;  %1759 = vmatprep.subr.mxu1 %v612_v10  ;;  %v2593_v2 = vld [vmem:[%s443_s8] ss:$0 sm:$0xff]  ;;  %p2917_p0 = scmp.ne.s32.totalorder %s2915_s24, 0  ;;  %s2082_s16 = scalar_lea.vmem %s2081_s19, 512 }
  0xdc   : > { %1736 = vmatprep.subr.mxu0 %v509_v11  ;;  %1760 = vmatpush3.msra.mxu1 %v612_v10  ;;  %p2083_p13 = scmp.lt.s32.totalorder %s2806_s23, %s2081_s19  ;;  %p2084_p2 = scmp.lt.s32.totalorder %s2082_s16, %s2076_s9 }
  0xdd   : > { %1737 = vmatpush3.msra.mxu0 %v509_v11  ;;  %1761 = vmatprep.subr.mxu1 %v611_v12  ;;  %s2804_s10 = scalar_lea.hbm %s2916_s26, %s1697_s25  ;;  %p2078_p6 = pnand %p2077_p5, %p2917_p0 }
  0xde   : > { %1738 = vmatprep.subr.mxu0 %v508_v13  ;;  %1762 = vmatpush3.msra.mxu1 %v611_v12  ;;  %p2085_p3 = por %p2084_p2, %p2083_p13 }
  0xdf   : > { %1739 = vmatpush3.msra.mxu0 %v508_v13  ;;  %1763 = vmatprep.subr.mxu1 %v610_v14  ;;  %p2079_p11 = pneg %p2078_p6 }
  0xe0   : > { %1740 = vmatprep.subr.mxu0 %v507_v15  ;;  %1764 = vmatpush3.msra.mxu1 %v610_v14 }
  0xe1   : > { %1741 = vmatpush3.msra.mxu0 %v507_v15  ;;  %1765 = vmatprep.subr.mxu1 %v609_v16  ;;  %p2086_p7 = pnand %p2085_p3, %p2079_p11 }
  0xe2   : > { %1742 = vmatprep.subr.mxu0 %v506_v17  ;;  %1766 = vmatpush3.msra.mxu1 %v609_v16 }
  0xe3   : > { %1743 = vmatpush3.msra.mxu0 %v506_v17  ;;  %1767 = vmatprep.subr.mxu1 %v608_v18 }
  0xe4   : > { %1744 = vmatprep.subr.mxu0 %v505_v19  ;;  %1768 = vmatpush3.msra.mxu1 %v608_v18 }
  0xe5   : > { %1769 = vmatprep.mubr.msk.f32.mxu1 %vm522_vm1, %v503_v20  ;;  %1745 = vmatpush3.msra.mxu0 %v505_v19 }
  0xe6   : > { %1746 = vmatprep.mubr.msk.f32.mxu0 %vm522_vm1, %v503_v20  ;;  %1770 = vmatmul.mubr.msk.f32.vlgmr.msra.gmra.mxu1 %vm522_vm1, %v504_v21 }
  0xe7   : > { %1747 = vmatmul.mubr.msk.f32.vlgmr.msra.gmra.mxu0 %vm522_vm1, %v504_v21 }
 0x1a6   : > { %v1771_v34 = vpop.f32.mrf.mxu1 }
 0x1a7   : > { %v1748_v35 = vpop.f32.mrf.mxu0  ;;  %v700_v36 = vadd.f32 %v1771_v34, %v1684_v31 }
 0x1a8   : > { %v2541_v37 = vadd.f32 %v1748_v35, %v1680_v32  ;;  %v694_v38 = vpop.f32.mrf.mxu1 }
 0x1a9   : > { %v599_v39 = vpop.f32.mrf.mxu0  ;;  %v757_v40 = vcombine.high %v700_v36, %v700_v36  ;;  %v764_v41 = vrot.slane %v700_v36, %v2539_v33  ;;  %v695_v42 = vadd.f32 %v1684_v31, %v694_v38 }
 0x1aa   : > { %v2544_v43 = vadd.f32 %v1680_v32, %v599_v39  ;;  %1772 = vmatprep.subr.mxu0 %v2541_v37 }
 0x1ab   : > { %1773 = vmatpush3.msra.mxu0 %v2541_v37  ;;  %v2551_v45 = vrot.slane %v757_v40, %v2539_v33  ;;  %v772_v46 = vcombine.high %v764_v41, %v764_v41  ;;  %v780_v47 = vrot.slane %v764_v41, %v2539_v33  ;;  %v708_v48 = vcombine.high %v695_v42, %v695_v42 }
 0x1ac   : > { %1774 = vmatprep.subr.mxu0 %v2544_v43  ;;  %v715_v49 = vrot.slane %v695_v42, %v2539_v33 }
 0x1ad   : > { %1775 = vmatpush3.msra.mxu0 %v2544_v43  ;;  %v2558_v50 = vrot.slane %v772_v46, %v2539_v33  ;;  %v802_v51 = vcombine.high %v780_v47, %v780_v47  ;;  %v841_v52 = vrot.slane %v780_v47, %v2547_v44  ;;  %v2566_v55 = vrot.slane %v2551_v45, %v2539_v33 }
 0x1ae   : > { %v723_v53 = vcombine.high %v715_v49, %v715_v49  ;;  %v2562_v54 = vrot.slane %v715_v49, %v2539_v33  ;;  %v2569_v56 = vrot.slane %v708_v48, %v2539_v33  ;;  %v773_v41 = vcombine.high %v2551_v45, %v2551_v45 }
 0x1af   : > { %v845_v57 = vrot.slane %v2558_v50, %v2547_v44  ;;  %v849_v58 = vrot.slane %v802_v51, %v2547_v44  ;;  %v903_v61 = vadd.f32 %v841_v52, %v2541_v37  ;;  %v2582_v62 = vrot.slane %v2566_v55, %v2547_v44 }
 0x1b0   : > { %v2575_v59 = vrot.slane %v723_v53, %v2539_v33  ;;  %v809_v60 = vrot.slane %v2562_v54, %v2547_v44  ;;  %v2586_v63 = vrot.slane %v2569_v56, %v2539_v33  ;;  %v902_v0 = vadd.f32 %v841_v52, %v2544_v43 }
 0x1b1   : > { %vm935_vm2 = vcmp.ge.f32.partialorder %v903_v61, 0.0  ;;  %v967_v3 = vmul.f32 0.2, %v903_v61  ;;  %v905_v4 = vadd.f32 %v845_v57, %v2541_v37  ;;  %v907_v7 = vadd.f32 %v849_v58, %v2541_v37 }
 0x1b2   : > { %v813_v1 = vrot.slane %v2575_v59, %v2547_v44  ;;  %vm934_vm3 = vcmp.ge.f32.partialorder %v902_v0, 0.0  ;;  %v966_v5 = vmul.f32 0.2, %v902_v0  ;;  %v886_v6 = vadd.f32 %v809_v60, %v2544_v43 }
 0x1b3   : > { %v999_v8 = vsel %vm935_vm2, %v903_v61, %v967_v3  ;;  %vm937_vm4 = vcmp.ge.f32.partialorder %v905_v4, 0.0  ;;  %v969_v9 = vmul.f32 0.2, %v905_v4  ;;  %v887_v10 = vadd.f32 %v809_v60, %v2541_v37 }
 0x1b4   : > { %v1037_v11 = vmul.f32 %v2593_v2, %v999_v8  ;;  %v998_v12 = vsel %vm934_vm3, %v902_v0, %v966_v5  ;;  %vm918_vm5 = vcmp.ge.f32.partialorder %v886_v6, 0.0  ;;  %v950_v13 = vmul.f32 0.2, %v886_v6 }
 0x1b5   : > { %v1036_v14 = vmul.f32 %v2593_v2, %v998_v12  ;;  %v1001_v15 = vsel %vm937_vm4, %v905_v4, %v969_v9  ;;  %vm939_vm6 = vcmp.ge.f32.partialorder %v907_v7, 0.0  ;;  %v971_v16 = vmul.f32 0.2, %v907_v7 }
 0x1b6   : > { %v1103_v17 = vsel %vm522_vm1, %v1037_v11, 0.0  ;;  %v1039_v18 = vmul.f32 %v2593_v2, %v1001_v15  ;;  %v982_v19 = vsel %vm918_vm5, %v886_v6, %v950_v13  ;;  %vm919_vm7 = vcmp.ge.f32.partialorder %v887_v10, 0.0 }
 0x1b7   : > { %1104 = vadd.xlane.f32.xlu1 %v1103_v17  ;;  %v1100_v20 = vsel %vm522_vm1, %v1036_v14, 0.0  ;;  %v1020_v21 = vmul.f32 %v2593_v2, %v982_v19  ;;  %v1003_v22 = vsel %vm939_vm6, %v907_v7, %v971_v16  ;;  %v951_v23 = vmul.f32 0.2, %v887_v10 }
 0x1b8   : > { %v753_v24 = vcombine.high %v2562_v54, %v2562_v54  ;;  %1101 = vadd.xlane.f32.xlu0 %v1100_v20  ;;  %v1109_v26 = vsel %vm522_vm1, %v1039_v18, 0.0  ;;  %v911_v28 = vadd.f32 %v2582_v62, %v2541_v37  ;;  %v904_v29 = vadd.f32 %v845_v57, %v2544_v43 }
 0x1b9   : > { %v1041_v30 = vmul.f32 %v2593_v2, %v1003_v22  ;;  %v983_v31 = vsel %vm919_vm7, %v887_v10, %v951_v23  ;;  %v888_v32 = vadd.f32 %v813_v1, %v2544_v43  ;;  %v906_v34 = vadd.f32 %v849_v58, %v2544_v43 }
 0x1ba   : > { %v1052_v35 = vsel %vm522_vm1, %v1020_v21, 0.0  ;;  %v1021_v36 = vmul.f32 %v2593_v2, %v983_v31  ;;  %vm943_vm8 = vcmp.ge.f32.partialorder %v911_v28, 0.0  ;;  %v975_v38 = vmul.f32 0.2, %v911_v28 }
 0x1bb   : > { %1110 = vadd.xlane.f32.xlu1 %v1109_v26  ;;  %vm936_vm9 = vcmp.ge.f32.partialorder %v904_v29, 0.0  ;;  %v968_v39 = vmul.f32 0.2, %v904_v29  ;;  %vm920_vm10 = vcmp.ge.f32.partialorder %v888_v32, 0.0  ;;  %v952_v40 = vmul.f32 0.2, %v888_v32 }
 0x1bc   : > { %v825_v42 = vrot.slane %v2586_v63, %v2547_v44  ;;  %1053 = vadd.xlane.f32.xlu0 %v1052_v35  ;;  %v1007_v46 = vsel %vm943_vm8, %v911_v28, %v975_v38  ;;  %v970_v47 = vmul.f32 0.2, %v906_v34  ;;  %v817_v48 = vrot.slane %v753_v24, %v2547_v44 }
 0x1bd   : > { %v1000_v49 = vsel %vm936_vm9, %v904_v29, %v968_v39  ;;  %vm938_vm11 = vcmp.ge.f32.partialorder %v906_v34, 0.0  ;;  %v889_v51 = vadd.f32 %v813_v1, %v2541_v37  ;;  %v1115_v52 = vsel %vm522_vm1, %v1041_v30, 0.0 }
 0x1be   : > { %v1045_v53 = vmul.f32 %v2593_v2, %v1007_v46  ;;  %v984_v54 = vsel %vm920_vm10, %v888_v32, %v952_v40  ;;  %v910_v45 = vadd.f32 %v2582_v62, %v2544_v43  ;;  %v1055_v57 = vsel %vm522_vm1, %v1021_v36, 0.0 }
 0x1bf   : > { %1116 = vadd.xlane.f32.xlu1 %v1115_v52  ;;  %v1038_v58 = vmul.f32 %v2593_v2, %v1000_v49  ;;  %vm921_vm12 = vcmp.ge.f32.partialorder %v889_v51, 0.0  ;;  %v953_v60 = vmul.f32 0.2, %v889_v51  ;;  %v2629_v61 = vrot.slane %v773_v41, %v2539_v33 }
 0x1c0   : > { %v804_v0 = vcombine.high %v2558_v50, %v2558_v50  ;;  %1056 = vadd.xlane.f32.xlu0 %v1055_v57  ;;  %v1002_v1 = vsel %vm938_vm11, %v906_v34, %v970_v47  ;;  %v974_v3 = vmul.f32 0.2, %v910_v45  ;;  %v1022_v4 = vmul.f32 %v2593_v2, %v984_v54 }
 0x1c1   : > { %vm942_vm13 = vcmp.ge.f32.partialorder %v910_v45, 0.0  ;;  %v891_v62 = vadd.f32 %v817_v48, %v2541_v37  ;;  %v890_v5 = vadd.f32 %v817_v48, %v2544_v43  ;;  %v1127_v6 = vsel %vm522_vm1, %v1045_v53, 0.0 }
 0x1c2   : > { %v985_v7 = vsel %vm921_vm12, %v889_v51, %v953_v60  ;;  %v895_v8 = vadd.f32 %v825_v42, %v2541_v37  ;;  %v894_v9 = vadd.f32 %v825_v42, %v2544_v43  ;;  %v1106_v50 = vsel %vm522_vm1, %v1038_v58, 0.0 }
 0x1c3   : > { %1128 = vadd.xlane.f32.xlu1 %v1127_v6  ;;  %v1040_v10 = vmul.f32 %v2593_v2, %v1002_v1  ;;  %vm923_vm14 = vcmp.ge.f32.partialorder %v891_v62, 0.0  ;;  %v955_v11 = vmul.f32 0.2, %v891_v62  ;;  %v803_v12 = vcombine.high %v2566_v55, %v2566_v55 }
 0x1c4   : > { %1107 = vadd.xlane.f32.xlu0 %v1106_v50  ;;  %v1006_v13 = vsel %vm942_vm13, %v910_v45, %v974_v3  ;;  %v954_v14 = vmul.f32 0.2, %v890_v5  ;;  %v1058_v15 = vsel %vm522_vm1, %v1022_v4, 0.0  ;;  %v1023_v16 = vmul.f32 %v2593_v2, %v985_v7 }
 0x1c5   : > { %vm922_vm15 = vcmp.ge.f32.partialorder %v890_v5, 0.0  ;;  %v959_v17 = vmul.f32 0.2, %v895_v8  ;;  %v987_v18 = vsel %vm923_vm14, %v891_v62, %v955_v11  ;;  %vm927_vm0 = vcmp.ge.f32.partialorder %v895_v8, 0.0 }
 0x1c6   : > { %v958_v19 = vmul.f32 0.2, %v894_v9  ;;  %v853_v20 = vrot.slane %v804_v0, %v2547_v44  ;;  %v1112_v21 = vsel %vm522_vm1, %v1040_v10, 0.0  ;;  %v1044_v22 = vmul.f32 %v2593_v2, %v1006_v13 }
 0x1c7   : > { %1059 = vadd.xlane.f32.xlu1 %v1058_v15  ;;  %vm926_vm2 = vcmp.ge.f32.partialorder %v894_v9, 0.0  ;;  %v861_v55 = vrot.slane %v2629_v61, %v2547_v44  ;;  %v724_v23 = vcombine.high %v2569_v56, %v2569_v56  ;;  %v986_v24 = vsel %vm922_vm15, %v890_v5, %v954_v14 }
 0x1c8   : > { %1113 = vadd.xlane.f32.xlu0 %v1112_v21  ;;  %v909_v26 = vadd.f32 %v853_v20, %v2541_v37  ;;  %v908_v28 = vadd.f32 %v853_v20, %v2544_v43  ;;  %v755_v29 = vcombine.high %v2575_v59, %v2575_v59  ;;  %v1025_v30 = vmul.f32 %v2593_v2, %v987_v18 }
 0x1c9   : > { %v991_v31 = vsel %vm927_vm0, %v895_v8, %v959_v17  ;;  %v913_v32 = vadd.f32 %v861_v55, %v2541_v37  ;;  %v1061_v34 = vsel %vm522_vm1, %v1023_v16, 0.0  ;;  %v990_v35 = vsel %vm926_vm2, %v894_v9, %v958_v19 }
 0x1ca   : > { %v973_v36 = vmul.f32 0.2, %v909_v26  ;;  %v912_v56 = vadd.f32 %v861_v55, %v2544_v43  ;;  %v1124_v38 = vsel %vm522_vm1, %v1044_v22, 0.0  ;;  %v1024_v39 = vmul.f32 %v2593_v2, %v986_v24 }
 0x1cb   : > { %1062 = vadd.xlane.f32.xlu1 %v1061_v34  ;;  %vm941_vm3 = vcmp.ge.f32.partialorder %v909_v26, 0.0  ;;  %v972_v40 = vmul.f32 0.2, %v908_v28  ;;  %v752_v59 = vrot.slane %v724_v23, %v2539_v33  ;;  %v1029_v41 = vmul.f32 %v2593_v2, %v991_v31 }
 0x1cc   : > { %1125 = vadd.xlane.f32.xlu0 %v1124_v38  ;;  %vm940_vm4 = vcmp.ge.f32.partialorder %v908_v28, 0.0  ;;  %v865_v42 = vrot.slane %v803_v12, %v2547_v44  ;;  %v1067_v46 = vsel %vm522_vm1, %v1025_v30, 0.0  ;;  %v1028_v47 = vmul.f32 %v2593_v2, %v990_v35 }
 0x1cd   : > { %vm945_vm5 = vcmp.ge.f32.partialorder %v913_v32, 0.0  ;;  %v977_v48 = vmul.f32 0.2, %v913_v32  ;;  %v1005_v49 = vsel %vm941_vm3, %v909_v26, %v973_v36  ;;  %v976_v51 = vmul.f32 0.2, %v912_v56 }
 0x1ce   : > { %v915_v52 = vadd.f32 %v865_v42, %v2541_v37  ;;  %v821_v53 = vrot.slane %v755_v29, %v2547_v44  ;;  %v1064_v33 = vsel %vm522_vm1, %v1024_v39, 0.0  ;;  %v1004_v54 = vsel %vm940_vm4, %v908_v28, %v972_v40 }
 0x1cf   : > { %1068 = vadd.xlane.f32.xlu1 %v1067_v46  ;;  %vm944_vm6 = vcmp.ge.f32.partialorder %v912_v56, 0.0  ;;  %v914_v45 = vadd.f32 %v865_v42, %v2544_v43  ;;  %v754_v57 = vcombine.high %v2586_v63, %v2586_v63  ;;  %v1079_v58 = vsel %vm522_vm1, %v1029_v41, 0.0 }
 0x1d0   : > { %1065 = vadd.xlane.f32.xlu0 %v1064_v33  ;;  %v1076_v60 = vsel %vm522_vm1, %v1028_v47, 0.0  ;;  %v1043_v0 = vmul.f32 %v2593_v2, %v1005_v49  ;;  %v1009_v1 = vsel %vm945_vm5, %v913_v32, %v977_v48  ;;  %v1042_v3 = vmul.f32 %v2593_v2, %v1004_v54 }
 0x1d1   : > { %v1008_v4 = vsel %vm944_vm6, %v912_v56, %v976_v51  ;;  %v979_v62 = vmul.f32 0.2, %v915_v52  ;;  %v893_v5 = vadd.f32 %v821_v53, %v2541_v37  ;;  %vm947_vm7 = vcmp.ge.f32.partialorder %v915_v52, 0.0 }
 0x1d2   : > { %v978_v6 = vmul.f32 0.2, %v914_v45  ;;  %v892_v63 = vadd.f32 %v821_v53, %v2544_v43  ;;  %v829_v7 = vrot.slane %v752_v59, %v2547_v44  ;;  %vm946_vm8 = vcmp.ge.f32.partialorder %v914_v45, 0.0 }
 0x1d3   : > { %1080 = vadd.xlane.f32.xlu1 %v1079_v58  ;;  %v756_v8 = vcombine.high %v752_v59, %v752_v59  ;;  %v1121_v9 = vsel %vm522_vm1, %v1043_v0, 0.0  ;;  %v1047_v50 = vmul.f32 %v2593_v2, %v1009_v1  ;;  %v1046_v10 = vmul.f32 %v2593_v2, %v1008_v4 }
 0x1d4   : > { %1077 = vadd.xlane.f32.xlu0 %v1076_v60  ;;  %v1118_v11 = vsel %vm522_vm1, %v1042_v3, 0.0  ;;  %v1011_v12 = vsel %vm947_vm7, %v915_v52, %v979_v62  ;;  %vm925_vm9 = vcmp.ge.f32.partialorder %v893_v5, 0.0  ;;  %v957_v13 = vmul.f32 0.2, %v893_v5 }
 0x1d5   : > { %v1010_v14 = vsel %vm946_vm8, %v914_v45, %v978_v6  ;;  %v956_v15 = vmul.f32 0.2, %v892_v63  ;;  %v897_v16 = vadd.f32 %v829_v7, %v2541_v37  ;;  %v833_v17 = vrot.slane %v754_v57, %v2547_v44 }
 0x1d6   : > { %vm924_vm10 = vcmp.ge.f32.partialorder %v892_v63, 0.0  ;;  %v896_v18 = vadd.f32 %v829_v7, %v2544_v43  ;;  %v805_v19 = vcombine.high %v2629_v61, %v2629_v61  ;;  %v1133_v20 = vsel %vm522_vm1, %v1047_v50, 0.0 }
 0x1d7   : > { %1122 = vadd.xlane.f32.xlu1 %v1121_v9  ;;  %v1130_v21 = vsel %vm522_vm1, %v1046_v10, 0.0  ;;  %v1049_v22 = vmul.f32 %v2593_v2, %v1011_v12  ;;  %v1048_v55 = vmul.f32 %v2593_v2, %v1010_v14  ;;  %v989_v23 = vsel %vm925_vm9, %v893_v5, %v957_v13 }
 0x1d8   : > { %1119 = vadd.xlane.f32.xlu0 %v1118_v11  ;;  %v988_v24 = vsel %vm924_vm10, %v892_v63, %v956_v15  ;;  %v961_v26 = vmul.f32 0.2, %v897_v16  ;;  %v899_v28 = vadd.f32 %v833_v17, %v2541_v37  ;;  %v837_v29 = vrot.slane %v756_v8, %v2547_v44 }
 0x1d9   : > { %vm929_vm11 = vcmp.ge.f32.partialorder %v897_v16, 0.0  ;;  %v960_v30 = vmul.f32 0.2, %v896_v18  ;;  %v898_v61 = vadd.f32 %v833_v17, %v2544_v43  ;;  %vm928_vm12 = vcmp.ge.f32.partialorder %v896_v18, 0.0 }
 0x1da   : > { %v1139_v31 = vsel %vm522_vm1, %v1049_v22, 0.0  ;;  %v1136_v32 = vsel %vm522_vm1, %v1048_v55, 0.0  ;;  %v1027_v34 = vmul.f32 %v2593_v2, %v989_v23  ;;  %v1026_v35 = vmul.f32 %v2593_v2, %v988_v24 }
 0x1db   : > { %1134 = vadd.xlane.f32.xlu1 %v1133_v20  ;;  %v993_v36 = vsel %vm929_vm11, %v897_v16, %v961_v26  ;;  %v963_v56 = vmul.f32 0.2, %v899_v28  ;;  %v901_v38 = vadd.f32 %v837_v29, %v2541_v37  ;;  %v869_v39 = vrot.slane %v805_v19, %v2547_v44 }
 0x1dc   : > { %1131 = vadd.xlane.f32.xlu0 %v1130_v21  ;;  %v992_v40 = vsel %vm928_vm12, %v896_v18, %v960_v30  ;;  %vm931_vm13 = vcmp.ge.f32.partialorder %v899_v28, 0.0  ;;  %v962_v59 = vmul.f32 0.2, %v898_v61  ;;  %v900_v41 = vadd.f32 %v837_v29, %v2544_v43 }
 0x1dd   : > { %vm930_vm14 = vcmp.ge.f32.partialorder %v898_v61, 0.0  ;;  %v1073_v42 = vsel %vm522_vm1, %v1027_v34, 0.0  ;;  %v1070_v46 = vsel %vm522_vm1, %v1026_v35, 0.0  ;;  %v1031_v47 = vmul.f32 %v2593_v2, %v993_v36 }
 0x1de   : > { %v1030_v48 = vmul.f32 %v2593_v2, %v992_v40  ;;  %v995_v49 = vsel %vm931_vm13, %v899_v28, %v963_v56  ;;  %v965_v51 = vmul.f32 0.2, %v901_v38  ;;  %v917_v44 = vadd.f32 %v869_v39, %v2541_v37 }
 0x1df   : > { %1140 = vadd.xlane.f32.xlu1 %v1139_v31  ;;  %v994_v52 = vsel %vm930_vm14, %v898_v61, %v962_v59  ;;  %vm933_vm15 = vcmp.ge.f32.partialorder %v901_v38, 0.0  ;;  %v964_v53 = vmul.f32 0.2, %v900_v41  ;;  %v916_v33 = vadd.f32 %v869_v39, %v2544_v43 }
 0x1e0   : > { %1137 = vadd.xlane.f32.xlu0 %v1136_v32  ;;  %vm932_vm0 = vcmp.ge.f32.partialorder %v900_v41, 0.0  ;;  %v1085_v54 = vsel %vm522_vm1, %v1031_v47, 0.0  ;;  %v1033_v45 = vmul.f32 %v2593_v2, %v995_v49  ;;  %v1082_v57 = vsel %vm522_vm1, %v1030_v48, 0.0 }
 0x1e1   : > { %v1032_v58 = vmul.f32 %v2593_v2, %v994_v52  ;;  %v997_v60 = vsel %vm933_vm15, %v901_v38, %v965_v51  ;;  %v981_v0 = vmul.f32 0.2, %v917_v44  ;;  %v996_v37 = vsel %vm932_vm0, %v900_v41, %v964_v53 }
 0x1e2   : > { %vm949_vm2 = vcmp.ge.f32.partialorder %v917_v44, 0.0  ;;  %v980_v1 = vmul.f32 0.2, %v916_v33  ;;  %vm948_vm3 = vcmp.ge.f32.partialorder %v916_v33, 0.0  ;;  %v1091_v3 = vsel %vm522_vm1, %v1033_v45, 0.0 }
 0x1e3   : > { %1074 = vadd.xlane.f32.xlu1 %v1073_v42  ;;  %v1035_v43 = vmul.f32 %v2593_v2, %v997_v60  ;;  %v1088_v4 = vsel %vm522_vm1, %v1032_v58, 0.0  ;;  %v1034_v62 = vmul.f32 %v2593_v2, %v996_v37  ;;  %v1013_v5 = vsel %vm949_vm2, %v917_v44, %v981_v0 }
 0x1e4   : > { %1071 = vadd.xlane.f32.xlu0 %v1070_v46  ;;  %v1012_v6 = vsel %vm948_vm3, %v916_v33, %v980_v1  ;;  %v1051_v7 = vmul.f32 %v2593_v2, %v1013_v5  ;;  %vm1193_vm4 = vcmask 130112   ;;  %vm1330_vm5 = vcmask 1041409  }
 0x1e5   : > { %v1097_v63 = vsel %vm522_vm1, %v1035_v43, 0.0  ;;  %v1094_v8 = vsel %vm522_vm1, %v1034_v62, 0.0  ;;  %v1050_v9 = vmul.f32 %v2593_v2, %v1012_v6  ;;  %vm1332_vm6 = vcmask 1042434  }
 0x1e6   : > { %v1145_v50 = vsel %vm522_vm1, %v1051_v7, 0.0  ;;  %vm1334_vm7 = vcmask 1043459   ;;  %vm1336_vm8 = vcmask 1044484   ;;  %vm1338_vm9 = vcmask 1045509  }
 0x1e7   : > { %1086 = vadd.xlane.f32.xlu1 %v1085_v54  ;;  %v1142_v10 = vsel %vm522_vm1, %v1050_v9, 0.0  ;;  %vm1340_vm10 = vcmask 1046534   ;;  %vm1342_vm11 = vcmask 1047559   ;;  %vm1355_vm13 = vcmask 130048  }
 0x1e8   : > { %1083 = vadd.xlane.f32.xlu0 %v1082_v57 }
 0x1eb   : > { %1092 = vadd.xlane.f32.xlu1 %v1091_v3 }
 0x1ec   : > { %1089 = vadd.xlane.f32.xlu0 %v1088_v4 }
 0x1ef   : > { %1098 = vadd.xlane.f32.xlu1 %v1097_v63 }
 0x1f0   : > { %1095 = vadd.xlane.f32.xlu0 %v1094_v8 }
 0x1f3   : > { %1146 = vadd.xlane.f32.xlu1 %v1145_v50 }
 0x1f4   : > { %1143 = vadd.xlane.f32.xlu0 %v1142_v10 }
 0x240   : > { %v1105_v11 = vpop.xlane.xlu1 %1104 }
 0x241   : > { %v1265_v12 = vrot.slane %v1105_v11, %v2533_v27  ;;  %v1102_v13 = vpop.xlane.xlu0 %1101 }
 0x242   : > { %v1261_v14 = vrot.slane %v1102_v13, %v2531_v25 }
 0x244   : > { %v1266_v15 = vsel %vm1193_vm4, %v1265_v12, %v1261_v14  ;;  %v1111_v16 = vpop.xlane.xlu1 %1110 }
 0x245   : > { %v1054_v17 = vpop.xlane.xlu0 %1053  ;;  %v1274_v23 = vrot.slane %v1111_v16, %v2533_v27 }
 0x246   : > { %v1187_v19 = vrot.slane %v1054_v17, %v2531_v25 }
 0x248   : > { %v1117_v18 = vpop.xlane.xlu1 %1116 }
 0x249   : > { %v1057_v2 = vpop.xlane.xlu0 %1056  ;;  %v1283_v61 = vrot.slane %v1117_v18, %v2533_v27 }
 0x24a   : > { %v1192_v20 = vrot.slane %v1057_v2, %v2533_v27 }
 0x24c   : > { %v1194_v21 = vsel %vm1193_vm4, %v1192_v20, %v1187_v19  ;;  %v1129_v22 = vpop.xlane.xlu1 %1128 }
 0x24d   : > { %v1108_v55 = vpop.xlane.xlu0 %1107  ;;  %v1301_v39 = vrot.slane %v1129_v22, %v2533_v27 }
 0x24e   : > { %v1270_v24 = vrot.slane %v1108_v55, %v2531_v25 }
 0x250   : > { %v1275_v26 = vsel %vm1193_vm4, %v1274_v23, %v1270_v24  ;;  %v1060_v28 = vpop.xlane.xlu1 %1059 }
 0x251   : > { %v1344_v29 = vsel %vm1330_vm5, %v1275_v26, %v1266_v15  ;;  %v1114_v30 = vpop.xlane.xlu0 %1113  ;;  %v1198_v35 = vrot.slane %v1060_v28, %v2531_v25 }
 0x252   : > { %v1279_v31 = vrot.slane %v1114_v30, %v2531_v25 }
 0x254   : > { %v1284_v32 = vsel %vm1193_vm4, %v1283_v61, %v1279_v31  ;;  %v1063_v34 = vpop.xlane.xlu1 %1062  ;;  %v704_v61 = vld [vmem:[#allocation13] sm:$0xff] }
 0x255   : > { %v1345_v36 = vsel %vm1332_vm6, %v1284_v32, %v1344_v29  ;;  %v1202_v56 = vrot.slane %v1063_v34, %v2533_v27  ;;  %v1126_v38 = vpop.xlane.xlu0 %1125  ;;  %vm1148_vm12 = vcmp.gt.f32.partialorder %v704_v61, 0.0 }
 0x256   : > { %v1297_v40 = vrot.slane %v1126_v38, %v2531_v25  ;;  %v705_v38 = vld [vmem:[#allocation13 + $0x8] sm:$0xff] }
 0x257   : > { %v1203_v59 = vsel %vm1193_vm4, %v1202_v56, %v1198_v35  ;;  %vm1149_vm14 = vcmp.gt.f32.partialorder %v705_v38, 0.0 }
 0x258   : > { %v1331_v41 = vsel %vm1330_vm5, %v1203_v59, %v1194_v21  ;;  %v1302_v42 = vsel %vm1193_vm4, %v1301_v39, %v1297_v40  ;;  %v1069_v46 = vpop.xlane.xlu1 %1068 }
 0x259   : > { %v1211_v47 = vrot.slane %v1069_v46, %v2533_v27  ;;  %v1066_v48 = vpop.xlane.xlu0 %1065 }
 0x25a   : > { %v1207_v49 = vrot.slane %v1066_v48, %v2531_v25 }
 0x25c   : > { %v1212_v51 = vsel %vm1193_vm4, %v1211_v47, %v1207_v49  ;;  %v1081_v44 = vpop.xlane.xlu1 %1080 }
 0x25d   : > { %v1333_v52 = vsel %vm1332_vm6, %v1212_v51, %v1331_v41  ;;  %v1229_v53 = vrot.slane %v1081_v44, %v2533_v27  ;;  %v1078_v33 = vpop.xlane.xlu0 %1077 }
 0x25e   : > { %v1225_v54 = vrot.slane %v1078_v33, %v2531_v25 }
 0x260   : > { %v1230_v45 = vsel %vm1193_vm4, %v1229_v53, %v1225_v54  ;;  %v1123_v57 = vpop.xlane.xlu1 %1122 }
 0x261   : > { %v1292_v58 = vrot.slane %v1123_v57, %v2533_v27  ;;  %v1120_v60 = vpop.xlane.xlu0 %1119 }
 0x262   : > { %v1288_v0 = vrot.slane %v1120_v60, %v2531_v25 }
 0x264   : > { %v1293_v37 = vsel %vm1193_vm4, %v1292_v58, %v1288_v0  ;;  %v1135_v1 = vpop.xlane.xlu1 %1134 }
 0x265   : > { %v1346_v3 = vsel %vm1334_vm7, %v1293_v37, %v1345_v36  ;;  %v1310_v43 = vrot.slane %v1135_v1, %v2533_v27  ;;  %v1132_v4 = vpop.xlane.xlu0 %1131 }
 0x266   : > { %v1306_v62 = vrot.slane %v1132_v4, %v2531_v25  ;;  %v1347_v5 = vsel %vm1336_vm8, %v1302_v42, %v1346_v3 }
 0x268   : > { %v1311_v6 = vsel %vm1193_vm4, %v1310_v43, %v1306_v62  ;;  %v1141_v63 = vpop.xlane.xlu1 %1140 }
 0x269   : > { %v1319_v7 = vrot.slane %v1141_v63, %v2533_v27  ;;  %v1138_v8 = vpop.xlane.xlu0 %1137  ;;  %v1348_v9 = vsel %vm1338_vm9, %v1311_v6, %v1347_v5  ;;  %v1689_v5 = vld [vmem:[%s502_s27] ss:$0 sm:$0xff] }
 0x26a   : > { %v1315_v50 = vrot.slane %v1138_v8, %v2531_v25 }
 0x26c   : > { %v1320_v10 = vsel %vm1193_vm4, %v1319_v7, %v1315_v50  ;;  %v1075_v11 = vpop.xlane.xlu1 %1074 }
 0x26d   : > { %v1220_v12 = vrot.slane %v1075_v11, %v2533_v27  ;;  %v1072_v13 = vpop.xlane.xlu0 %1071  ;;  %v1349_v14 = vsel %vm1340_vm10, %v1320_v10, %v1348_v9 }
 0x26e   : > { %v1216_v15 = vrot.slane %v1072_v13, %v2531_v25 }
 0x270   : > { %v1221_v16 = vsel %vm1193_vm4, %v1220_v12, %v1216_v15  ;;  %v1087_v17 = vpop.xlane.xlu1 %1086 }
 0x271   : > { %v1335_v18 = vsel %vm1334_vm7, %v1221_v16, %v1333_v52  ;;  %v1238_v2 = vrot.slane %v1087_v17, %v2533_v27  ;;  %v1084_v19 = vpop.xlane.xlu0 %1083 }
 0x272   : > { %v1234_v20 = vrot.slane %v1084_v19, %v2531_v25  ;;  %v1337_v21 = vsel %vm1336_vm8, %v1230_v45, %v1335_v18 }
 0x274   : > { %v1239_v22 = vsel %vm1193_vm4, %v1238_v2, %v1234_v20  ;;  %v1093_v55 = vpop.xlane.xlu1 %1092 }
 0x275   : > { %v1247_v23 = vrot.slane %v1093_v55, %v2533_v27  ;;  %v1090_v24 = vpop.xlane.xlu0 %1089  ;;  %v1339_v26 = vsel %vm1338_vm9, %v1239_v22, %v1337_v21 }
 0x276   : > { %v1243_v28 = vrot.slane %v1090_v24, %v2531_v25 }
 0x278   : > { %v1248_v29 = vsel %vm1193_vm4, %v1247_v23, %v1243_v28  ;;  %v1099_v30 = vpop.xlane.xlu1 %1098 }
 0x279   : > { %v1256_v31 = vrot.slane %v1099_v30, %v2533_v27  ;;  %v1096_v32 = vpop.xlane.xlu0 %1095  ;;  %v1341_v34 = vsel %vm1340_vm10, %v1248_v29, %v1339_v26 }
 0x27a   : > { %v1252_v35 = vrot.slane %v1096_v32, %v2531_v25 }
 0x27c   : > { %v1147_v36 = vpop.xlane.xlu1 %1146  ;;  %v1257_v56 = vsel %vm1193_vm4, %v1256_v31, %v1252_v35 }
 0x27d   : > { %v1328_v39 = vrot.slane %v1147_v36, %v2533_v27  ;;  %v1144_v40 = vpop.xlane.xlu0 %1143  ;;  %v1343_v59 = vsel %vm1342_vm11, %v1257_v56, %v1341_v34 }
 0x27e   : > { %v1324_v41 = vrot.slane %v1144_v40, %v2531_v25  ;;  %v1353_v42 = vsel %vm1148_vm12, %v1343_v59, -1e+30 }
 0x27f   : > { %v1356_v46 = vsel %vm1355_vm13, %v1353_v42, -inf }
 0x280   : > { %1357 = vmax.xlane.f32.xlu0 %v1356_v46  ;;  %v1329_v47 = vsel %vm1193_vm4, %v1328_v39, %v1324_v41 }
 0x281   : > { %v1350_v48 = vsel %vm1342_vm11, %v1329_v47, %v1349_v14 }
 0x282   : > { %v1354_v49 = vsel %vm1149_vm14, %v1350_v48, -1e+30 }
 0x283   : > { %v1359_v51 = vsel %vm1355_vm13, %v1354_v49, -inf }
 0x284   : > { %1360 = vmax.xlane.f32.xlu1 %v1359_v51 }
 0x309   : > { %v1358_v44 = vpop.xlane.xlu0 %1357 }
 0x30a   : > { %v1362_v27 = vsub.f32 %v1353_v42, %v1358_v44 }
 0x30c   : > { %v1364_v52 = vmul.f32 1.442695, %v1362_v27 }
 0x30d   : > { %v1361_v53 = vpop.xlane.xlu1 %1360 }
 0x30e   : > { %1876 = vpow2.f32 %v1364_v52  ;;  %v1363_v25 = vsub.f32 %v1354_v49, %v1361_v53 }
 0x310   : > { %v1366_v33 = vmul.f32 1.442695, %v1363_v25 }
 0x312   : > { %1878 = vpow2.f32 %v1366_v33 }
 0x31b   : > { %v1877_v54 = vpop.eup %1876 }
 0x31c   : > { %v1368_v45 = vsel %vm1148_vm12, %v1877_v54, 0.0 }
 0x31d   : > { %v1370_v57 = vsel %vm1355_vm13, %v1368_v45, 0.0 }
 0x31e   : > { %1371 = vadd.xlane.f32.xlu0 %v1370_v57 }
 0x31f   : > { %v1879_v58 = vpop.eup %1878 }
 0x320   : > { %v1369_v60 = vsel %vm1149_vm14, %v1879_v58, 0.0 }
 0x321   : > { %v1373_v0 = vsel %vm1355_vm13, %v1369_v60, 0.0 }
 0x322   : > { %1374 = vadd.xlane.f32.xlu1 %v1373_v0 }
 0x3a7   : > { %v1372_v37 = vpop.xlane.xlu0 %1371 }
 0x3a8   : > { %1880 = vrcp.f32 %v1372_v37 }
 0x3ab   : > { %v1375_v1 = vpop.xlane.xlu1 %1374 }
 0x3ac   : > { %1882 = vrcp.f32 %v1375_v1 }
 0x3b5   : > { %v1881_v3 = vpop.eup %1880 }
 0x3b6   : > { %v1378_v43 = vmul.f32 %v1881_v3, %v1368_v45 }
 0x3b8   : > { %1776 = vmatprep.mubr.msk.f32.mxu0 %vm1355_vm13, %v1378_v43 }
 0x3b9   : > { %v1883_v4 = vpop.eup %1882 }
 0x3ba   : > { %v1379_v62 = vmul.f32 %v1883_v4, %v1369_v60 }
 0x3bc   : > { %1777 = vmatmul.mubr.msk.f32.vlgmr.msra.gmra.mxu0 %vm1355_vm13, %v1379_v62 }
 0x47c   : > { %v1778_v6 = vpop.f32.mrf.mxu0 }
 0x47d   : > { %v1465_v63 = vadd.f32 %v1778_v6, %v1689_v5 }
 0x47e   : > { %v1459_v7 = vpop.f32.mrf.mxu0 }
 0x47f   : > { %v1469_v8 = vmax.f32 %v1465_v63, 0.0  ;;  %v1460_v9 = vadd.f32 %v1689_v5, %v1459_v7 }
 0x481   : > { %1471 = vst.msk [vmem:[%s499_s13 + $0x8] sm:$0xff] %vm522_vm1, %v1469_v8  ;;  %v1468_v50 = vmax.f32 %v1460_v9, 0.0 }
 0x483   : > { %1470 = vst.msk [vmem:[%s499_s13] sm:$0xff] %vm522_vm1, %v1468_v50 }
 0x484   : > { %2089 = shalt.err (!%p2086_p7)
}
 0x485   : > { %s2090_s15 = scalar_lea.hbm %s2804_s10, 256  ;;  %s2094_s8 = scalar_lea.hbm %s2916_s26, 2560 }
 0x486   : > { %p2091_p8 = scmp.ne.s32.totalorder %s2804_s10, %s2090_s15  ;;  %p2095_p9 = scmp.lt.s32.totalorder %s2804_s10, %s2916_s26 }
 0x487   : > { %p2096_p10 = scmp.lt.s32.totalorder %s2094_s8, %s2090_s15 }
 0x488   : > { %p2092_p12 = pnand %p2091_p8, %p2917_p0 }
 0x489   : > { %p2097_p1 = por %p2096_p10, %p2095_p9 }
 0x48a   : > { %p2093_p4 = pneg %p2092_p12 }
 0x48c   : > { %p2098_p5 = pnand %p2097_p1, %p2093_p4 }
 0x48e   : > { %2101 = shalt.err (!%p2098_p5)
}
 0x48f   : > { %s2169_s29 = smov 128   ;;  %s2170_s18 = smov 8  }
 0x490   : > { %1802 = dma.vmem_to_hbm [thread:$0]  (%p2917_p0), %s2806_s23, 256, %s2804_s10, %s1473_s14, %s2169_s29, %s2169_s29, %s2170_s18  }
 0x491 PF: > { %s2918_s21 = sld [smem:[#allocation21_spill]]  ;;  %p1836_p6 = scmp.ge.s32.totalorder %s2156_s30, 2 }
 0x492   : > { %s2919_s27 = sld [smem:[#allocation27_spill]] }
 0x497   : > { %s1501_s13 = sand.u32 1, %s2918_s21  }
 0x498   : > { %p2920_p11 = scmp.ne.s32.totalorder %s2919_s27, 0  ;;  %s1502_s25 = scalar_lea.sflag [#allocation4], %s1501_s13 }
 0x49a   : > { %p1828_p13 = pnand %p1836_p6, %p2920_p11 }
 0x49c   : > { %p1829_p2 = pneg %p1828_p13 }
 0x49e   : > { %2139 = dma.done.wait (%p1829_p2), %s1502_s25, 256  }
 0x49f   : > { %2141 = vsyncadd (%p1829_p2), %s1502_s25, 4294967040  ;;  %s2921_s30 = sld [smem:[#allocation23_spill]]  ;;  %s2924_s27 = smov %s2148_s28 }
 0x4a0   : > { %s2922_s1 = sld [smem:[#allocation22_spill]] }
 0x4a1   : > { %s2923_s29 = sld [smem:[#allocation24_spill]] }
 0x4a5   : > { %p28_p3 = scmp.ge.s32.totalorder %s2921_s30, 12  }
 0x4a6   : > { %s2925_s28 = smov %s2922_s1 }
 0x4a7   :  { %30 = sbr.rel (!%p28_p3) target bundleno = 15 (0xf), region = 157 }
 0x4ac   :  { %1507 = vsyncpa [#allocation3], 1 }
 0x4ad   :  { %1509 = vsyncpa [#allocation3 + $0x1], 1 }
 0x4ae   :  { %1510 = vsyncpa [#allocation6], 1 }
 0x4af   :  { %1512 = vsyncpa [#allocation6 + $0x1], 1 }
 0x4b0   :  { %1513 = vsyncpa [#allocation9], 1 }
 0x4b1   :  { %1515 = vsyncpa [#allocation9 + $0x1], 1 }
 0x4b2   :  { %1516 = vsyncpa [#allocation12], 1 }
 0x4b3   :  { %1518 = vsyncpa [#allocation12 + $0x1], 1 }
 0x4b4   :  { %1519 = vsyncpa [#allocation4], 1 }
 0x4b5   :  { %1521 = vsyncpa [#allocation4 + $0x1], 1 }

</bundles_post_ra>
